<compile_context>
chip_gen: v7x
topology: tpu7x:2x2x1
jax: 0.10.0
libtpu: 0.0.40
codegen_flags: <defaults>
</compile_context>

<pallas_src>
import functools
import math

import jax
import jax.numpy as jnp
from jax import lax
from jax.experimental import pallas as pl
from jax.experimental.pallas import tpu as pltpu


def _round_up(x: int, m: int) -> int:
    return ((x + m - 1) // m) * m


def _negclip_kernel(scale_ref, dims_ref,
                    img_q_ref, txt_q_ref, img_k_ref, txt_k_ref,
                    out_ref,
                    m_a, l_a, m_b, l_b,
                    *, compute_dtype):
    """One (query-row-tile, key-col-tile) step of the streaming NegCLIP loss.

    scale_ref : SMEM (1, 1) f32   -- logit_scale
    dims_ref  : SMEM (2,)   i32   -- [2B (unpadded rows), B]
    img_q_ref : VMEM (TM, Dp) f32 -- image features, query rows
    txt_q_ref : VMEM (TM, Dp) f32 -- text  features, query rows
    img_k_ref : VMEM (TK, Dp) f32 -- image features, key columns
    txt_k_ref : VMEM (TK, Dp) f32 -- text  features, key columns
    out_ref   : VMEM (TM, 1)  f32 -- per-row loss contribution (written at last k)
    m_*, l_*  : VMEM (TM, 1)  f32 -- online logsumexp state (a: fused img@txt.T,
                                     b: txt[:B]@img.T)
    """
    i = pl.program_id(0)
    k = pl.program_id(1)
    nk = pl.num_programs(1)

    scale = scale_ref[0, 0]
    n_valid = dims_ref[0]          # 2B (number of real rows/cols)
    b = dims_ref[1]                # B

    tm = img_q_ref.shape[0]
    tk = img_k_ref.shape[0]
    neg = jnp.float32(-1e30)

    @pl.when(k == 0)
    def _init():
        m_a[...] = jnp.full_like(m_a, -1e30)
        l_a[...] = jnp.zeros_like(l_a)
        m_b[...] = jnp.full_like(m_b, -1e30)
        l_b[...] = jnp.zeros_like(l_b)

    # Mask for padded key columns (global col index >= 2B).
    col_ids = k * tk + lax.broadcasted_iota(jnp.int32, (1, tk), 1)
    col_ok = col_ids < n_valid

    # Apply logit_scale to the query side (cheaper than scaling the logits tile).
    q_img = img_q_ref[...] * scale                       # (TM, Dp), f32
    k_txt = txt_k_ref[...]

    # --- term A: fused logits1+logits3 = scale * img @ txt.T -----------------
    s_a = jnp.einsum('md,nd->mn',
                     q_img.astype(compute_dtype),
                     k_txt.astype(compute_dtype),
                     preferred_element_type=jnp.float32)  # (TM, TK)
    s_a = jnp.where(col_ok, s_a, neg)
    m_a_new = jnp.maximum(m_a[...], jnp.max(s_a, axis=-1, keepdims=True))
    l_a[...] = (l_a[...] * jnp.exp(m_a[...] - m_a_new)
                + jnp.sum(jnp.exp(s_a - m_a_new), axis=-1, keepdims=True))
    m_a[...] = m_a_new

    # --- term B: logits2 = scale * txt[:B] @ img.T ---------------------------
    # Only needed for query tiles that contain rows < B.
    @pl.when(i * tm < b)
    def _do_b():
        q_txt = txt_q_ref[...] * scale
        k_img = img_k_ref[...]
        s_b = jnp.einsum('md,nd->mn',
                         q_txt.astype(compute_dtype),
                         k_img.astype(compute_dtype),
                         preferred_element_type=jnp.float32)
        s_b = jnp.where(col_ok, s_b, neg)
        m_b_new = jnp.maximum(m_b[...], jnp.max(s_b, axis=-1, keepdims=True))
        l_b[...] = (l_b[...] * jnp.exp(m_b[...] - m_b_new)
                    + jnp.sum(jnp.exp(s_b - m_b_new), axis=-1, keepdims=True))
        m_b[...] = m_b_new

    # --- finalize on the last key step ---------------------------------------
    @pl.when(k == nk - 1)
    def _finalize():
        lse_a = m_a[...] + jnp.log(l_a[...])             # (TM, 1)
        lse_b = m_b[...] + jnp.log(l_b[...])
        # Target logit of row r (for all three CE terms) = scale * <img[r], txt[r]>.
        diag = jnp.sum(q_img * txt_q_ref[...], axis=-1, keepdims=True)
        row_ids = i * tm + lax.broadcasted_iota(jnp.int32, (tm, 1), 0)
        ca = jnp.where(row_ids < n_valid, lse_a - diag, 0.0)  # CE1 (r<B) + CE3 (B<=r<2B)
        cb = jnp.where(row_ids < b, lse_b - diag, 0.0)        # CE2 (r<B)
        out_ref[...] = ca + cb


def negclip_loss(image_features, text_features, logit_scale, *,
                 tm=256, tk=512, compute_dtype=jnp.float32,
                 vmem_limit_bytes=48 * 1024 * 1024):
    """Scalar NegCLIP loss, matching CustomLossWithNegatives.forward."""
    n, d = image_features.shape
    assert text_features.shape == (n, d)
    assert n % 2 == 0, "image/text features must have 2*batch_size rows"
    b = n // 2

    # ---- tiling / padding (multiples of (8,128); D padded to 128) ----------
    n128 = _round_up(n, 128)
    tm = int(min(tm, n128))
    tk = int(min(tk, n128))
    n_pad = _round_up(n, math.lcm(tm, tk))
    d_pad = _round_up(d, 128)

    f32 = jnp.float32
    img = image_features.astype(f32)
    txt = text_features.astype(f32)
    if (n_pad, d_pad) != (n, d):
        img = jnp.pad(img, ((0, n_pad - n), (0, d_pad - d)))
        txt = jnp.pad(txt, ((0, n_pad - n), (0, d_pad - d)))

    scale_arr = jnp.asarray(logit_scale, f32).reshape(1, 1)
    dims_arr = jnp.array([n, b], jnp.int32)

    grid_m = n_pad // tm
    grid_k = n_pad // tk

    kernel = functools.partial(_negclip_kernel, compute_dtype=compute_dtype)

    contrib = pl.pallas_call(
        kernel,
        out_shape=jax.ShapeDtypeStruct((n_pad, 1), f32),
        grid_spec=pltpu.PrefetchScalarGridSpec(
            num_scalar_prefetch=0,
            grid=(grid_m, grid_k),
            in_specs=[
                pl.BlockSpec(memory_space=pltpu.MemorySpace.SMEM),  # logit_scale
                pl.BlockSpec(memory_space=pltpu.MemorySpace.SMEM),  # [2B, B]
                pl.BlockSpec((tm, d_pad), lambda i, k: (i, 0)),     # img, query rows
                pl.BlockSpec((tm, d_pad), lambda i, k: (i, 0)),     # txt, query rows
                pl.BlockSpec((tk, d_pad), lambda i, k: (k, 0)),     # img, key cols
                pl.BlockSpec((tk, d_pad), lambda i, k: (k, 0)),     # txt, key cols
            ],
            out_specs=pl.BlockSpec((tm, 1), lambda i, k: (i, 0)),
            scratch_shapes=[pltpu.VMEM((tm, 1), f32)] * 4,
        ),
        compiler_params=pltpu.CompilerParams(
            dimension_semantics=("parallel", "arbitrary"),
            vmem_limit_bytes=vmem_limit_bytes,
        ),
    )(scale_arr, dims_arr, img, txt, img, txt)

    return jnp.sum(contrib) / (3.0 * b)


def _reference_loss(img, txt, scale):
    """Pure-JAX reference with the exact PyTorch semantics."""
    n = img.shape[0]
    b = n // 2
    txt_rev = jnp.concatenate([txt[b:], txt[:b]], axis=0)

    def ce(logits):
        lse = jax.nn.logsumexp(logits, axis=-1)
        idx = jnp.arange(logits.shape[0])
        return jnp.mean(lse - logits[idx, idx])

    return (ce(scale * img[:b] @ txt.T)
            + ce(scale * txt[:b] @ img.T)
            + ce(scale * img[b:] @ txt_rev.T)) / 3.0


def _make_inputs(key, two_b, d):
    k1, k2 = jax.random.split(key)
    img = jax.random.normal(k1, (two_b, d), jnp.float32)
    txt = jax.random.normal(k2, (two_b, d), jnp.float32)
    img = img / jnp.linalg.norm(img, axis=-1, keepdims=True)
    txt = txt / jnp.linalg.norm(txt, axis=-1, keepdims=True)
    return img, txt


if __name__ == "__main__":
    key = jax.random.PRNGKey(0)
    logit_scale = jnp.float32(100.0)

    # Test 1: tiny shapes from the module spec (2*B = 8, hidden = 32); 1x1 grid
    # with heavy row/col padding.
    img, txt = _make_inputs(key, 8, 32)
    loss = jax.block_until_ready(negclip_loss(img, txt, logit_scale))
    ref = _reference_loss(img, txt, logit_scale)
    assert jnp.allclose(loss, ref, atol=5e-3, rtol=5e-3), (loss, ref)

    # Test 2: multi-tile grid (2x2) with row/col masking and the B-row skip:
    # 2*B = 200 rows (padded to 256), hidden = 96 (padded to 128), TM = TK = 128.
    img2, txt2 = _make_inputs(jax.random.PRNGKey(1), 200, 96)
    loss2 = jax.block_until_ready(
        negclip_loss(img2, txt2, logit_scale, tm=128, tk=128))
    ref2 = _reference_loss(img2, txt2, logit_scale)
    assert jnp.allclose(loss2, ref2, atol=5e-3, rtol=5e-3), (loss2, ref2)

    print("KERNEL_OK")
</pallas_src>

<mosaic_0001>
module attributes {stable_mosaic.version = 11 : i64} {
  func.func @_negclip_kernel(%arg0: i32, %arg1: i32, %arg2: memref<1x1xf32, #tpu.memory_space<smem>>, %arg3: memref<2xi32, #tpu.memory_space<smem>>, %arg4: memref<128x128xf32, #tpu.memory_space<vmem>>, %arg5: memref<128x128xf32, #tpu.memory_space<vmem>>, %arg6: memref<128x128xf32, #tpu.memory_space<vmem>>, %arg7: memref<128x128xf32, #tpu.memory_space<vmem>>, %arg8: memref<128x1xf32, #tpu.memory_space<vmem>>, %arg9: memref<128x1xf32, #tpu.memory_space<vmem>>, %arg10: memref<128x1xf32, #tpu.memory_space<vmem>>, %arg11: memref<128x1xf32, #tpu.memory_space<vmem>>, %arg12: memref<128x1xf32, #tpu.memory_space<vmem>>) attributes {dimension_semantics = [#tpu.dimension_semantics<parallel>, #tpu.dimension_semantics<arbitrary>], iteration_bounds = array<i64: 1, 1>, scalar_prefetch = 0 : i64, scratch_operands = 4 : i64, tpu.core_type = #tpu.core_type<tc>, window_params = [{transform_indices = @transform_0, window_bounds = array<i64: 1, 1>}, {transform_indices = @transform_1, window_bounds = array<i64: 2>}, {transform_indices = @transform_2, window_bounds = array<i64: 128, 128>}, {transform_indices = @transform_3, window_bounds = array<i64: 128, 128>}, {transform_indices = @transform_4, window_bounds = array<i64: 128, 128>}, {transform_indices = @transform_5, window_bounds = array<i64: 128, 128>}, {transform_indices = @transform_6, window_bounds = array<i64: 128, 1>}]} {
    %c0 = arith.constant 0 : index
    %c0_0 = arith.constant 0 : index
    %0 = memref.load %arg2[%c0, %c0_0] : memref<1x1xf32, #tpu.memory_space<smem>>
    %c0_1 = arith.constant 0 : index
    %1 = memref.load %arg3[%c0_1] : memref<2xi32, #tpu.memory_space<smem>>
    %c1 = arith.constant 1 : index
    %2 = memref.load %arg3[%c1] : memref<2xi32, #tpu.memory_space<smem>>
    %c0_i32 = arith.constant 0 : i32
    %3 = arith.cmpi eq, %arg1, %c0_i32 : i32
    %4 = arith.extui %3 : i1 to i32
    %c0_i32_2 = arith.constant 0 : i32
    %5 = arith.cmpi ne, %4, %c0_i32_2 : i32
    scf.if %5 {
      %cst_25 = arith.constant -1.000000e+30 : f32
      %45 = vector.broadcast %cst_25 : f32 to vector<128x1xf32>
      %c0_26 = arith.constant 0 : index
      %c0_27 = arith.constant 0 : index
      %46 = vector.load %arg9[%c0_26, %c0_27] : memref<128x1xf32, #tpu.memory_space<vmem>>, vector<128x1xf32>
      tpu.vector_store %arg9[%c0_26, %c0_27], %45 {strides = array<i32>} : memref<128x1xf32, #tpu.memory_space<vmem>>, vector<128x1xf32>,
      %cst_28 = arith.constant 0.000000e+00 : f32
      %47 = vector.broadcast %cst_28 : f32 to vector<128x1xf32>
      %c0_29 = arith.constant 0 : index
      %c0_30 = arith.constant 0 : index
      %48 = vector.load %arg10[%c0_29, %c0_30] : memref<128x1xf32, #tpu.memory_space<vmem>>, vector<128x1xf32>
      tpu.vector_store %arg10[%c0_29, %c0_30], %47 {strides = array<i32>} : memref<128x1xf32, #tpu.memory_space<vmem>>, vector<128x1xf32>,
      %cst_31 = arith.constant -1.000000e+30 : f32
      %49 = vector.broadcast %cst_31 : f32 to vector<128x1xf32>
      %c0_32 = arith.constant 0 : index
      %c0_33 = arith.constant 0 : index
      %50 = vector.load %arg11[%c0_32, %c0_33] : memref<128x1xf32, #tpu.memory_space<vmem>>, vector<128x1xf32>
      tpu.vector_store %arg11[%c0_32, %c0_33], %49 {strides = array<i32>} : memref<128x1xf32, #tpu.memory_space<vmem>>, vector<128x1xf32>,
      %cst_34 = arith.constant 0.000000e+00 : f32
      %51 = vector.broadcast %cst_34 : f32 to vector<128x1xf32>
      %c0_35 = arith.constant 0 : index
      %c0_36 = arith.constant 0 : index
      %52 = vector.load %arg12[%c0_35, %c0_36] : memref<128x1xf32, #tpu.memory_space<vmem>>, vector<128x1xf32>
      tpu.vector_store %arg12[%c0_35, %c0_36], %51 {strides = array<i32>} : memref<128x1xf32, #tpu.memory_space<vmem>>, vector<128x1xf32>,
    } else {
    }
    %c128_i32 = arith.constant 128 : i32
    %6 = arith.muli %arg1, %c128_i32 : i32
    %7 = tpu.iota {dimensions = array<i32: 1>} : vector<1x128xi32>
    %8 = vector.broadcast %6 : i32 to vector<1x128xi32>
    %9 = arith.addi %8, %7 : vector<1x128xi32>
    %10 = vector.broadcast %1 : i32 to vector<1x128xi32>
    %11 = arith.cmpi slt, %9, %10 : vector<1x128xi32>
    %c0_3 = arith.constant 0 : index
    %c0_4 = arith.constant 0 : index
    %12 = vector.load %arg4[%c0_3, %c0_4] : memref<128x128xf32, #tpu.memory_space<vmem>>, vector<128x128xf32>
    %13 = vector.broadcast %0 : f32 to vector<128x128xf32>
    %14 = arith.mulf %12, %13 : vector<128x128xf32>
    %c0_5 = arith.constant 0 : index
    %c0_6 = arith.constant 0 : index
    %15 = vector.load %arg7[%c0_5, %c0_6] : memref<128x128xf32, #tpu.memory_space<vmem>>, vector<128x128xf32>
    "tpu.trace_start"() <{level = 10 : i32, message = "md,nd->mn"}> : () -> ()
    %cst = arith.constant dense<0.000000e+00> : vector<128x128xf32>
    %16 = tpu.matmul %14, %15, %cst {dimension_numbers = #tpu.dot_dimension_numbers<[1], [1], [0], [0], [0, 0, 1, 0], [], []>} : vector<128x128xf32>, vector<128x128xf32>, vector<128x128xf32> -> vector<128x128xf32>
    %cst_7 = arith.constant -1.000000e+30 : f32
    "tpu.trace_stop"() : () -> ()
    %17 = vector.shape_cast %11 : vector<1x128xi1> to vector<1x128xi1>
    %18 = vector.broadcast %17 : vector<1x128xi1> to vector<128x128xi1>
    %19 = vector.broadcast %cst_7 : f32 to vector<128x128xf32>
    %20 = arith.select %18, %16, %19 : vector<128x128xi1>, vector<128x128xf32>
    %c0_8 = arith.constant 0 : index
    %c0_9 = arith.constant 0 : index
    %21 = vector.load %arg9[%c0_8, %c0_9] : memref<128x1xf32, #tpu.memory_space<vmem>>, vector<128x1xf32>
    %cst_10 = arith.constant dense<0xFF800000> : vector<128xf32>
    %22 = vector.multi_reduction <maximumf>, %20, %cst_10 [1] : vector<128x128xf32> to vector<128xf32>
    %23 = vector.shape_cast %22 : vector<128xf32> to vector<128x1xf32>
    %24 = arith.maximumf %21, %23 : vector<128x1xf32>
    %c0_11 = arith.constant 0 : index
    %c0_12 = arith.constant 0 : index
    %25 = vector.load %arg10[%c0_11, %c0_12] : memref<128x1xf32, #tpu.memory_space<vmem>>, vector<128x1xf32>
    %c0_13 = arith.constant 0 : index
    %c0_14 = arith.constant 0 : index
    %26 = vector.load %arg9[%c0_13, %c0_14] : memref<128x1xf32, #tpu.memory_space<vmem>>, vector<128x1xf32>
    %27 = arith.subf %26, %24 : vector<128x1xf32>
    %28 = math.exp %27 : vector<128x1xf32>
    %29 = arith.mulf %25, %28 : vector<128x1xf32>
    %30 = vector.broadcast %24 : vector<128x1xf32> to vector<128x128xf32>
    %31 = arith.subf %20, %30 : vector<128x128xf32>
    %32 = math.exp %31 : vector<128x128xf32>
    %cst_15 = arith.constant dense<0.000000e+00> : vector<128xf32>
    %33 = vector.multi_reduction <add>, %32, %cst_15 [1] : vector<128x128xf32> to vector<128xf32>
    %34 = vector.shape_cast %33 : vector<128xf32> to vector<128x1xf32>
    %35 = arith.addf %29, %34 : vector<128x1xf32>
    %c0_16 = arith.constant 0 : index
    %c0_17 = arith.constant 0 : index
    %36 = vector.load %arg10[%c0_16, %c0_17] : memref<128x1xf32, #tpu.memory_space<vmem>>, vector<128x1xf32>
    tpu.vector_store %arg10[%c0_16, %c0_17], %35 {strides = array<i32>} : memref<128x1xf32, #tpu.memory_space<vmem>>, vector<128x1xf32>,
    %c0_18 = arith.constant 0 : index
    %c0_19 = arith.constant 0 : index
    %37 = vector.load %arg9[%c0_18, %c0_19] : memref<128x1xf32, #tpu.memory_space<vmem>>, vector<128x1xf32>
    tpu.vector_store %arg9[%c0_18, %c0_19], %24 {strides = array<i32>} : memref<128x1xf32, #tpu.memory_space<vmem>>, vector<128x1xf32>,
    %c128_i32_20 = arith.constant 128 : i32
    %38 = arith.muli %arg0, %c128_i32_20 : i32
    %39 = arith.cmpi slt, %38, %2 : i32
    %40 = arith.extui %39 : i1 to i32
    %cst_21 = arith.constant -1.000000e+30 : f32
    %c0_i32_22 = arith.constant 0 : i32
    %41 = arith.cmpi ne, %40, %c0_i32_22 : i32
    scf.if %41 {
      %c0_25 = arith.constant 0 : index
      %c0_26 = arith.constant 0 : index
      %45 = vector.load %arg5[%c0_25, %c0_26] : memref<128x128xf32, #tpu.memory_space<vmem>>, vector<128x128xf32>
      %46 = vector.broadcast %0 : f32 to vector<128x128xf32>
      %47 = arith.mulf %45, %46 : vector<128x128xf32>
      %c0_27 = arith.constant 0 : index
      %c0_28 = arith.constant 0 : index
      %48 = vector.load %arg6[%c0_27, %c0_28] : memref<128x128xf32, #tpu.memory_space<vmem>>, vector<128x128xf32>
      "tpu.trace_start"() <{level = 10 : i32, message = "md,nd->mn"}> : () -> ()
      %cst_29 = arith.constant dense<0.000000e+00> : vector<128x128xf32>
      %49 = tpu.matmul %47, %48, %cst_29 {dimension_numbers = #tpu.dot_dimension_numbers<[1], [1], [0], [0], [0, 0, 1, 0], [], []>} : vector<128x128xf32>, vector<128x128xf32>, vector<128x128xf32> -> vector<128x128xf32>
      "tpu.trace_stop"() : () -> ()
      %50 = vector.shape_cast %11 : vector<1x128xi1> to vector<1x128xi1>
      %51 = vector.broadcast %50 : vector<1x128xi1> to vector<128x128xi1>
      %52 = vector.broadcast %cst_21 : f32 to vector<128x128xf32>
      %53 = arith.select %51, %49, %52 : vector<128x128xi1>, vector<128x128xf32>
      %c0_30 = arith.constant 0 : index
      %c0_31 = arith.constant 0 : index
      %54 = vector.load %arg11[%c0_30, %c0_31] : memref<128x1xf32, #tpu.memory_space<vmem>>, vector<128x1xf32>
      %cst_32 = arith.constant dense<0xFF800000> : vector<128xf32>
      %55 = vector.multi_reduction <maximumf>, %53, %cst_32 [1] : vector<128x128xf32> to vector<128xf32>
      %56 = vector.shape_cast %55 : vector<128xf32> to vector<128x1xf32>
      %57 = arith.maximumf %54, %56 : vector<128x1xf32>
      %c0_33 = arith.constant 0 : index
      %c0_34 = arith.constant 0 : index
      %58 = vector.load %arg12[%c0_33, %c0_34] : memref<128x1xf32, #tpu.memory_space<vmem>>, vector<128x1xf32>
      %c0_35 = arith.constant 0 : index
      %c0_36 = arith.constant 0 : index
      %59 = vector.load %arg11[%c0_35, %c0_36] : memref<128x1xf32, #tpu.memory_space<vmem>>, vector<128x1xf32>
      %60 = arith.subf %59, %57 : vector<128x1xf32>
      %61 = math.exp %60 : vector<128x1xf32>
      %62 = arith.mulf %58, %61 : vector<128x1xf32>
      %63 = vector.broadcast %57 : vector<128x1xf32> to vector<128x128xf32>
      %64 = arith.subf %53, %63 : vector<128x128xf32>
      %65 = math.exp %64 : vector<128x128xf32>
      %cst_37 = arith.constant dense<0.000000e+00> : vector<128xf32>
      %66 = vector.multi_reduction <add>, %65, %cst_37 [1] : vector<128x128xf32> to vector<128xf32>
      %67 = vector.shape_cast %66 : vector<128xf32> to vector<128x1xf32>
      %68 = arith.addf %62, %67 : vector<128x1xf32>
      %c0_38 = arith.constant 0 : index
      %c0_39 = arith.constant 0 : index
      %69 = vector.load %arg12[%c0_38, %c0_39] : memref<128x1xf32, #tpu.memory_space<vmem>>, vector<128x1xf32>
      tpu.vector_store %arg12[%c0_38, %c0_39], %68 {strides = array<i32>} : memref<128x1xf32, #tpu.memory_space<vmem>>, vector<128x1xf32>,
      %c0_40 = arith.constant 0 : index
      %c0_41 = arith.constant 0 : index
      %70 = vector.load %arg11[%c0_40, %c0_41] : memref<128x1xf32, #tpu.memory_space<vmem>>, vector<128x1xf32>
      tpu.vector_store %arg11[%c0_40, %c0_41], %57 {strides = array<i32>} : memref<128x1xf32, #tpu.memory_space<vmem>>, vector<128x1xf32>,
    } else {
    }
    %c0_i32_23 = arith.constant 0 : i32
    %42 = arith.cmpi eq, %arg1, %c0_i32_23 : i32
    %43 = arith.extui %42 : i1 to i32
    %c0_i32_24 = arith.constant 0 : i32
    %44 = arith.cmpi ne, %43, %c0_i32_24 : i32
    scf.if %44 {
      %c0_25 = arith.constant 0 : index
      %c0_26 = arith.constant 0 : index
      %45 = vector.load %arg9[%c0_25, %c0_26] : memref<128x1xf32, #tpu.memory_space<vmem>>, vector<128x1xf32>
      %c0_27 = arith.constant 0 : index
      %c0_28 = arith.constant 0 : index
      %46 = vector.load %arg10[%c0_27, %c0_28] : memref<128x1xf32, #tpu.memory_space<vmem>>, vector<128x1xf32>
      %47 = math.log %46 : vector<128x1xf32>
      %48 = arith.addf %45, %47 : vector<128x1xf32>
      %c0_29 = arith.constant 0 : index
      %c0_30 = arith.constant 0 : index
      %49 = vector.load %arg11[%c0_29, %c0_30] : memref<128x1xf32, #tpu.memory_space<vmem>>, vector<128x1xf32>
      %c0_31 = arith.constant 0 : index
      %c0_32 = arith.constant 0 : index
      %50 = vector.load %arg12[%c0_31, %c0_32] : memref<128x1xf32, #tpu.memory_space<vmem>>, vector<128x1xf32>
      %51 = math.log %50 : vector<128x1xf32>
      %52 = arith.addf %49, %51 : vector<128x1xf32>
      %c0_33 = arith.constant 0 : index
      %c0_34 = arith.constant 0 : index
      %53 = vector.load %arg5[%c0_33, %c0_34] : memref<128x128xf32, #tpu.memory_space<vmem>>, vector<128x128xf32>
      %54 = arith.mulf %14, %53 : vector<128x128xf32>
      %cst_35 = arith.constant dense<0.000000e+00> : vector<128xf32>
      %55 = vector.multi_reduction <add>, %54, %cst_35 [1] : vector<128x128xf32> to vector<128xf32>
      %56 = vector.shape_cast %55 : vector<128xf32> to vector<128x1xf32>
      %c128_i32_36 = arith.constant 128 : i32
      %57 = arith.muli %arg0, %c128_i32_36 : i32
      %58 = tpu.iota {dimensions = array<i32: 0>} : vector<128x1xi32>
      %59 = vector.broadcast %57 : i32 to vector<128x1xi32>
      %60 = arith.addi %59, %58 : vector<128x1xi32>
      %61 = vector.broadcast %1 : i32 to vector<128x1xi32>
      %62 = arith.cmpi slt, %60, %61 : vector<128x1xi32>
      %63 = arith.subf %48, %56 : vector<128x1xf32>
      %cst_37 = arith.constant 0.000000e+00 : f32
      %64 = vector.broadcast %cst_37 : f32 to vector<128x1xf32>
      %65 = arith.select %62, %63, %64 : vector<128x1xi1>, vector<128x1xf32>
      %66 = vector.broadcast %2 : i32 to vector<128x1xi32>
      %67 = arith.cmpi slt, %60, %66 : vector<128x1xi32>
      %68 = arith.subf %52, %56 : vector<128x1xf32>
      %cst_38 = arith.constant 0.000000e+00 : f32
      %69 = vector.broadcast %cst_38 : f32 to vector<128x1xf32>
      %70 = arith.select %67, %68, %69 : vector<128x1xi1>, vector<128x1xf32>
      %71 = arith.addf %65, %70 : vector<128x1xf32>
      %c0_39 = arith.constant 0 : index
      %c0_40 = arith.constant 0 : index
      %72 = vector.load %arg8[%c0_39, %c0_40] : memref<128x1xf32, #tpu.memory_space<vmem>>, vector<128x1xf32>
      tpu.vector_store %arg8[%c0_39, %c0_40], %71 {strides = array<i32>} : memref<128x1xf32, #tpu.memory_space<vmem>>, vector<128x1xf32>,
    } else {
    }
    return
  }
  func.func @transform_0(%arg0: i32, %arg1: i32) -> (i32, i32) {
    %c0_i32 = arith.constant 0 : i32
    %c0_i32_0 = arith.constant 0 : i32
    %c0_i32_1 = arith.constant 0 : i32
    return %c0_i32, %c0_i32_0 : i32, i32
  }
  func.func @transform_1(%arg0: i32, %arg1: i32) -> i32 {
    %c0_i32 = arith.constant 0 : i32
    %c0_i32_0 = arith.constant 0 : i32
    return %c0_i32 : i32
  }
  func.func @transform_2(%arg0: i32, %arg1: i32) -> (i32, i32) {
    %c0_i32 = arith.constant 0 : i32
    %c0_i32_0 = arith.constant 0 : i32
    return %arg0, %c0_i32 : i32, i32
  }
  func.func @transform_3(%arg0: i32, %arg1: i32) -> (i32, i32) {
    %c0_i32 = arith.constant 0 : i32
    %c0_i32_0 = arith.constant 0 : i32
    return %arg0, %c0_i32 : i32, i32
  }
  func.func @transform_4(%arg0: i32, %arg1: i32) -> (i32, i32) {
    %c0_i32 = arith.constant 0 : i32
    %c0_i32_0 = arith.constant 0 : i32
    return %arg1, %c0_i32 : i32, i32
  }
  func.func @transform_5(%arg0: i32, %arg1: i32) -> (i32, i32) {
    %c0_i32 = arith.constant 0 : i32
    %c0_i32_0 = arith.constant 0 : i32
    return %arg1, %c0_i32 : i32, i32
  }
  func.func @transform_6(%arg0: i32, %arg1: i32) -> (i32, i32) {
    %c0_i32 = arith.constant 0 : i32
    %c0_i32_0 = arith.constant 0 : i32
    return %arg0, %c0_i32 : i32, i32
  }
}

</mosaic_0001>

<bundles_post_ra>
// kernel: tpu_custom_call.1
= control target key start
LH: loop header
LB: loop body
LE: loop exit
PB: predicated region body
PF: predicated region fallthrough
CT: control target
= control target key end

     0   :  { %12 = vsyncpa [#allocation9], 0  ;;  %s3547_s0 = inlined_call_operand.<no memory space> [shape: f32[1,1], index: 0, kind: input, shape index: {}]   ;;  %s3548_s1 = inlined_call_operand.vmem [shape: s32[2], index: 1, kind: input, shape index: {}]   ;;  %s3549_s2 = inlined_call_operand.hbm [shape: f32[128,128], index: 2, kind: input, shape index: {}]   ;;  %s3550_s3 = inlined_call_operand.hbm [shape: f32[128,128], index: 3, kind: input, shape index: {}]   ;;  %s3551_s4 = inlined_call_operand.hbm [shape: f32[128,128], index: 4, kind: input, shape index: {}]   ;;  %s3552_s5 = inlined_call_operand.hbm [shape: f32[128,128], index: 5, kind: input, shape index: {}]   ;;  %s3553_s6 = inlined_call_operand.vmem [shape: f32[128,1], index: 6, kind: output, shape index: {}]  }
   0x1   :  { %13 = vsyncpa [#allocation8], 0 }
   0x2   :  { %14 = vsyncpa [#allocation12], 0 }
   0x3   :  { %15 = vsyncpa [#allocation15], 0  ;;  %s24_s23 = sshll.u32 %s3548_s1, 4  ;;  %s2290_s24 = smov [#allocation11]   ;;  %s25_s23 = int_to_ptr.vmem [resolvable:$true] %s24_s23 }
   0x4   :  { %s45_s25 = sshll.u32 %s2290_s24, 4  ;;  %s2182_s28 = scalar_lea.hbm %s3550_s3, 2048  ;;  %s46_s25 = int_to_ptr.vmem [resolvable:$true] %s45_s25 }
   0x5   :  { %p2183_p0 = scmp.ne.s32.totalorder %s3550_s3, %s2182_s28  ;;  %p2186_p1 = scmp.lt.u32.totalorder %s2182_s28, %s3550_s3 }
   0x7   :  { %p2188_p2 = pnand %p2186_p1, %p2183_p0 }
   0x9   :  { %2191 = shalt.err (!%p2188_p2)
}
   0xa   :  { %s2192_s9 = scalar_lea.vmem %s46_s25, 2048  ;;  %p2197_p4 = scmp.lt.s32.totalorder %s46_s25, %s46_s25 }
   0xb   :  { %p2193_p3 = scmp.ne.s32.totalorder %s46_s25, %s2192_s9  ;;  %p2198_p5 = scmp.lt.s32.totalorder %s2192_s9, %s2192_s9 }
   0xd   :  { %p2199_p6 = por %p2198_p5, %p2197_p4 }
   0xf   :  { %p2200_p7 = pnand %p2199_p6, %p2193_p3 }
  0x11   :  { %2203 = shalt.err (!%p2200_p7)
}
  0x12   :  { %s2291_s1 = smov 128   ;;  %s2292_s10 = smov 8  }
  0x13   :  { %51 = dma.hbm_to_vmem [thread:$0]  %s3550_s3, 2048, %s46_s25, [#allocation12], %s2291_s1, %s2291_s1, %s2292_s10  }
  0x14   :  { %s2204_s13 = scalar_lea.vmem %s25_s23, 16  ;;  %p2209_p9 = scmp.lt.s32.totalorder %s25_s23, %s25_s23 }
  0x15   :  { %p2205_p8 = scmp.ne.s32.totalorder %s25_s23, %s2204_s13  ;;  %p2210_p10 = scmp.lt.s32.totalorder %s2204_s13, %s2204_s13 }
  0x17   :  { %p2211_p11 = por %p2210_p10, %p2209_p9 }
  0x19   :  { %p2212_p12 = pnand %p2211_p11, %p2205_p8 }
  0x1b   :  { %2215 = shalt.err (!%p2212_p12)
}
  0x1c   :  { %s2293_s14 = smov [#allocation7]   ;;  %s2294_s15 = smov [#allocation10]  }
  0x1d   :  { %27 = dma.vmem_to_smem %s25_s23, 16, %s2293_s14, [#allocation9]  }
  0x1e   :  { %s33_s16 = sshll.u32 %s2294_s15, 4  ;;  %s2295_s17 = smov [#allocation13]   ;;  %s34_s16 = int_to_ptr.vmem [resolvable:$true] %s33_s16 }
  0x1f   :  { %s57_s18 = sshll.u32 %s2295_s17, 4  ;;  %s2216_s3 = scalar_lea.hbm %s3549_s2, 2048  ;;  %s2354_s18 = int_to_ptr.vmem [resolvable:$true] %s57_s18 }
  0x20   :  { %p2217_p13 = scmp.ne.s32.totalorder %s3549_s2, %s2216_s3  ;;  %p2220_p0 = scmp.lt.u32.totalorder %s2216_s3, %s3549_s2 }
  0x22   :  { %p2222_p1 = pnand %p2220_p0, %p2217_p13 }
  0x24   :  { %2225 = shalt.err (!%p2222_p1)
}
  0x25   :  { %s2226_s23 = scalar_lea.vmem %s34_s16, 2048  ;;  %p2231_p3 = scmp.lt.s32.totalorder %s34_s16, %s34_s16 }
  0x26   :  { %p2227_p2 = scmp.ne.s32.totalorder %s34_s16, %s2226_s23  ;;  %p2232_p4 = scmp.lt.s32.totalorder %s2226_s23, %s2226_s23 }
  0x28   :  { %p2233_p5 = por %p2232_p4, %p2231_p3 }
  0x2a   :  { %p2234_p6 = pnand %p2233_p5, %p2227_p2 }
  0x2c   :  { %2237 = shalt.err (!%p2234_p6)
}
  0x2d   :  { %39 = dma.hbm_to_vmem [thread:$0]  %s3549_s2, 2048, %s34_s16, [#allocation8], %s2291_s1, %s2291_s1, %s2292_s10  }
  0x2e   :  { %s2238_s30 = scalar_lea.hbm %s3551_s4, 2048 }
  0x2f   :  { %p2239_p7 = scmp.ne.s32.totalorder %s3551_s4, %s2238_s30  ;;  %p2242_p8 = scmp.lt.u32.totalorder %s2238_s30, %s3551_s4 }
  0x31   :  { %p2244_p9 = pnand %p2242_p8, %p2239_p7 }
  0x33   :  { %2247 = shalt.err (!%p2244_p9)
}
  0x34   :  { %s2248_s12 = scalar_lea.vmem %s2354_s18, 2048  ;;  %p2253_p11 = scmp.lt.s32.totalorder %s2354_s18, %s2354_s18 }
  0x35   :  { %p2249_p10 = scmp.ne.s32.totalorder %s2354_s18, %s2248_s12  ;;  %p2254_p12 = scmp.lt.s32.totalorder %s2248_s12, %s2248_s12 }
  0x37   :  { %p2255_p13 = por %p2254_p12, %p2253_p11 }
  0x39   :  { %p2256_p0 = pnand %p2255_p13, %p2249_p10 }
  0x3b   :  { %2259 = shalt.err (!%p2256_p0)
}
  0x3c   :  { %63 = dma.hbm_to_vmem [thread:$0]  %s3551_s4, 2048, %s2354_s18, [#allocation12], %s2291_s1, %s2291_s1, %s2292_s10  }
  0x3d   :  { %s2296_s14 = smov [#allocation14]   ;;  %s2260_s19 = scalar_lea.hbm %s3552_s5, 2048 }
  0x3e   :  { %s69_s15 = sshll.u32 %s2296_s14, 4  ;;  %p2261_p1 = scmp.ne.s32.totalorder %s3552_s5, %s2260_s19  ;;  %s70_s15 = int_to_ptr.vmem [resolvable:$true] %s69_s15 }
  0x3f   :  { %p2264_p2 = scmp.lt.u32.totalorder %s2260_s19, %s3552_s5 }
  0x41   :  { %p2266_p3 = pnand %p2264_p2, %p2261_p1 }
  0x43   :  { %2269 = shalt.err (!%p2266_p3)
}
  0x44   :  { %s2270_s24 = scalar_lea.vmem %s70_s15, 2048  ;;  %p2275_p5 = scmp.lt.s32.totalorder %s70_s15, %s70_s15 }
  0x45   :  { %p2271_p4 = scmp.ne.s32.totalorder %s70_s15, %s2270_s24  ;;  %p2276_p6 = scmp.lt.s32.totalorder %s2270_s24, %s2270_s24 }
  0x47   :  { %p2277_p7 = por %p2276_p6, %p2275_p5 }
  0x49   :  { %p2278_p8 = pnand %p2277_p7, %p2271_p4 }
  0x4b   :  { %2281 = shalt.err (!%p2278_p8)
}
  0x4c   :  { %75 = dma.hbm_to_vmem [thread:$0]  %s3552_s5, 2048, %s70_s15, [#allocation15], %s2291_s1, %s2291_s1, %s2292_s10  }
  0x4d   :  { %2282 = dma.done.wait [#allocation9], 16  }
  0x4e   :  { %2283 = vsyncadd [#allocation9], 4294967280 }
  0x4f   :  { %2284 = dma.done.wait [#allocation8], 2048  }
  0x50   :  { %2285 = vsyncadd [#allocation8], 4294965248 }
  0x51   :  { %2286 = dma.done.wait [#allocation12], 4096  }
  0x52   :  { %2287 = vsyncadd [#allocation12], 4294963200 }
  0x53   :  { %2288 = dma.done.wait [#allocation15], 2048  }
  0x54   :  { %2289 = vsyncadd [#allocation15], 4294965248 }
  0x55   :  { %91 = sfence }
  0x56   :  { %s2406_s25 = sld [smem:[#allocation7 + $0x1]]  ;;  %v204_v0 = vld [vmem:[#allocation14] sm:$0xff]  ;;  %v205_v1 = vld [vmem:[#allocation14 + $0x8] sm:$0xff]  ;;  %v206_v2 = vld [vmem:[#allocation14 + $0x10] sm:$0xff]  ;;  %v2411_v6 = vstv %s3547_s0  ;;  %vm99_vm0 = vcmask 7168   ;;  %s93_s0 = sld [smem:[#allocation7]]  ;;  %v3554_v58 = vlaneseq }
  0x57   :  { %v1879_v3 = vpack.c.bf16 %v205_v1, %v204_v0  ;;  %v207_v4 = vld [vmem:[#allocation14 + $0x18] sm:$0xff]  ;;  %v171_v7 = vld [vmem:[#allocation10] sm:$0xff]  ;;  %v209_v10 = vld [vmem:[#allocation14 + $0x28] sm:$0xff]  ;;  %v2297_v57 = vmov -1e+30   ;;  %v3592_v61 = vmov 0 }
  0x58   :  { %v1883_v5 = vpack.c.bf16 %v207_v4, %v206_v2  ;;  %v179_v8 = vld [vmem:[#allocation10 + $0x40] sm:$0xff]  ;;  %v2414_v11 = vmul.f32 %v2411_v6, %v171_v7  ;;  %v210_v14 = vld [vmem:[#allocation14 + $0x30] sm:$0xff]  ;;  %v211_v15 = vld [vmem:[#allocation14 + $0x38] sm:$0xff]  ;;  %109 = vst.msk [vmem:[#allocation2 + $0x48] sm:$0xff] %vm99_vm0, %v2297_v57  ;;  %v166_v59 = vand.u32 127, %v3554_v58 }
  0x59   :  { %1880 = vmatprep.subr.bf16.mxu0 %v1879_v3  ;;  %1943 = vmatprep.subr.bf16.mxu1 %v1879_v3  ;;  %v208_v9 = vld [vmem:[#allocation14 + $0x20] sm:$0xff]  ;;  %v2417_v12 = vmul.f32 %v2411_v6, %v179_v8  ;;  %v1891_v16 = vpack.c.bf16 %v211_v15, %v210_v14  ;;  %v213_v18 = vld [vmem:[#allocation14 + $0x48] sm:$0xff]  ;;  %v214_v20 = vld [vmem:[#allocation14 + $0x50] sm:$0xff]  ;;  %100 = vst.msk [vmem:[#allocation2] sm:$0xff] %vm99_vm0, %v2297_v57 }
  0x5a   :  { %1882 = vmatpush3.bf16.xpose.msra.mxu0 %v1879_v3  ;;  %1951 = vmatpush3.bf16.xpose.msra.mxu1 %v1879_v3  ;;  %3575 = vst [vmem:[#allocation20_spill] sm:$0xff] %v2414_v11  ;;  %v1887_v13 = vpack.c.bf16 %v209_v10, %v208_v9  ;;  %v212_v17 = vld [vmem:[#allocation14 + $0x40] sm:$0xff]  ;;  %v215_v21 = vld [vmem:[#allocation14 + $0x58] sm:$0xff]  ;;  %v217_v24 = vld [vmem:[#allocation14 + $0x68] sm:$0xff] }
  0x5b   :  { %1884 = vmatprep.subr.bf16.mxu0 %v1883_v5  ;;  %1944 = vmatprep.subr.bf16.mxu1 %v1883_v5  ;;  %3576 = vst [vmem:[#allocation21_spill] sm:$0xff] %v2417_v12  ;;  %v1895_v19 = vpack.c.bf16 %v213_v18, %v212_v17  ;;  %v1899_v22 = vpack.c.bf16 %v215_v21, %v214_v20  ;;  %v216_v23 = vld [vmem:[#allocation14 + $0x60] sm:$0xff]  ;;  %v218_v26 = vld [vmem:[#allocation14 + $0x70] sm:$0xff]  ;;  %v219_v27 = vld [vmem:[#allocation14 + $0x78] sm:$0xff] }
  0x5c   :  { %1799 = vmatprep.mubr.f32.mxu0 %v2414_v11  ;;  %1811 = vmatprep.mubr.f32.mxu1 %v2417_v12  ;;  %v1903_v25 = vpack.c.bf16 %v217_v24, %v216_v23  ;;  %v1907_v28 = vpack.c.bf16 %v219_v27, %v218_v26  ;;  %v172_v29 = vld [vmem:[#allocation10 + $0x8] sm:$0xff]  ;;  %v173_v31 = vld [vmem:[#allocation10 + $0x10] sm:$0xff]  ;;  %v174_v36 = vld [vmem:[#allocation10 + $0x18] sm:$0xff]  ;;  %101 = vst.msk [vmem:[#allocation2 + $0x8] sm:$0xff] %vm99_vm0, %v2297_v57  ;;  %v2510_v60 = vstv %s93_s0  ;;  %p1702_p9 = scmp.le.s32.totalorder %s2406_s25, 0 }
  0x5d   :  { %v180_v30 = vld [vmem:[#allocation10 + $0x48] sm:$0xff]  ;;  %v181_v32 = vld [vmem:[#allocation10 + $0x50] sm:$0xff]  ;;  %v2422_v33 = vmul.f32 %v2411_v6, %v172_v29  ;;  %v2428_v35 = vmul.f32 %v2411_v6, %v173_v31  ;;  %v182_v38 = vld [vmem:[#allocation10 + $0x58] sm:$0xff]  ;;  %v2436_v41 = vmul.f32 %v2411_v6, %v174_v36  ;;  %102 = vst.msk [vmem:[#allocation2 + $0x10] sm:$0xff] %vm99_vm0, %v2297_v57  ;;  %vm2513_vm1 = vcmp.lt.s32.totalorder %v166_v59, %v2510_v60 }
  0x5e   :  { %v2425_v34 = vmul.f32 %v2411_v6, %v180_v30  ;;  %v2431_v37 = vmul.f32 %v2411_v6, %v181_v32  ;;  %v175_v39 = vld [vmem:[#allocation10 + $0x20] sm:$0xff]  ;;  %v2439_v42 = vmul.f32 %v2411_v6, %v182_v38  ;;  %v176_v44 = vld [vmem:[#allocation10 + $0x28] sm:$0xff]  ;;  %v177_v47 = vld [vmem:[#allocation10 + $0x30] sm:$0xff]  ;;  %103 = vst.msk [vmem:[#allocation2 + $0x18] sm:$0xff] %vm99_vm0, %v2297_v57  ;;  %v3593_v61 = vsel %vm2513_vm1, 4294967295, %v3592_v61 }
  0x5f   :  { %3577 = vst [vmem:[#allocation22_spill] sm:$0xff] %v2422_v33  ;;  %3579 = vst [vmem:[#allocation24_spill] sm:$0xff] %v2428_v35  ;;  %v183_v40 = vld [vmem:[#allocation10 + $0x60] sm:$0xff]  ;;  %v2444_v43 = vmul.f32 %v2411_v6, %v175_v39  ;;  %v184_v46 = vld [vmem:[#allocation10 + $0x68] sm:$0xff]  ;;  %v2452_v49 = vmul.f32 %v2411_v6, %v176_v44  ;;  %v2460_v51 = vmul.f32 %v2411_v6, %v177_v47  ;;  %v2298_v29 = vmov 0  }
  0x60   :  { %3578 = vst [vmem:[#allocation23_spill] sm:$0xff] %v2425_v34  ;;  %3580 = vst [vmem:[#allocation25_spill] sm:$0xff] %v2431_v37  ;;  %v2447_v45 = vmul.f32 %v2411_v6, %v183_v40  ;;  %v185_v48 = vld [vmem:[#allocation10 + $0x70] sm:$0xff]  ;;  %v2455_v50 = vmul.f32 %v2411_v6, %v184_v46  ;;  %v178_v52 = vld [vmem:[#allocation10 + $0x38] sm:$0xff]  ;;  %1987 = vset.pattern.permute.xlu0 %v2298_v29  ;;  %1986 = vset.pattern.permute.xlu1 %v2298_v29  ;;  %v2299_v32 = vmov 0.0  }
  0x61   :  { %3581 = vst [vmem:[#allocation26_spill] sm:$0xff] %v2436_v41  ;;  %3582 = vst [vmem:[#allocation27_spill] sm:$0xff] %v2439_v42  ;;  %v2463_v53 = vmul.f32 %v2411_v6, %v185_v48  ;;  %v186_v54 = vld [vmem:[#allocation10 + $0x78] sm:$0xff]  ;;  %v2468_v55 = vmul.f32 %v2411_v6, %v178_v52  ;;  %v2629_v39 = vld [vmem:[#allocation2 + $0x48] sm:$0xff] }
  0x62   :  { %1886 = vmatpush3.bf16.xpose.msra.mxu0 %v1883_v5  ;;  %1952 = vmatpush3.bf16.xpose.msra.mxu1 %v1883_v5  ;;  %3583 = vst [vmem:[#allocation28_spill] sm:$0xff] %v2444_v43  ;;  %3584 = vst [vmem:[#allocation29_spill] sm:$0xff] %v2447_v45  ;;  %v2471_v56 = vmul.f32 %v2411_v6, %v186_v54  ;;  %v2641_v54 = vld [vmem:[#allocation2] sm:$0xff] }
  0x63   :  { %1888 = vmatprep.subr.bf16.mxu0 %v1887_v13  ;;  %1945 = vmatprep.subr.bf16.mxu1 %v1887_v13  ;;  %3585 = vst [vmem:[#allocation30_spill] sm:$0xff] %v2452_v49  ;;  %3586 = vst [vmem:[#allocation31_spill] sm:$0xff] %v2455_v50  ;;  %v2631_v40 = vld [vmem:[#allocation2 + $0x8] sm:$0xff] }
  0x64   :  { %3587 = vst [vmem:[#allocation32_spill] sm:$0xff] %v2460_v51  ;;  %3588 = vst [vmem:[#allocation33_spill] sm:$0xff] %v2463_v53 }
  0x65   :  { %3589 = vst [vmem:[#allocation34_spill] sm:$0xff] %v2468_v55  ;;  %3590 = vst [vmem:[#allocation35_spill] sm:$0xff] %v2471_v56  ;;  %v2639_v52 = vld [vmem:[#allocation2 + $0x18] sm:$0xff] }
  0x66   :  { %104 = vst.msk [vmem:[#allocation2 + $0x20] sm:$0xff] %vm99_vm0, %v2297_v57  ;;  %105 = vst.msk [vmem:[#allocation2 + $0x28] sm:$0xff] %vm99_vm0, %v2297_v57 }
  0x67   :  { %106 = vst.msk [vmem:[#allocation2 + $0x30] sm:$0xff] %vm99_vm0, %v2297_v57  ;;  %107 = vst.msk [vmem:[#allocation2 + $0x38] sm:$0xff] %vm99_vm0, %v2297_v57 }
  0x68   :  { %108 = vst.msk [vmem:[#allocation2 + $0x40] sm:$0xff] %vm99_vm0, %v2297_v57  ;;  %110 = vst.msk [vmem:[#allocation2 + $0x50] sm:$0xff] %vm99_vm0, %v2297_v57 }
  0x69   :  { %111 = vst.msk [vmem:[#allocation2 + $0x58] sm:$0xff] %vm99_vm0, %v2297_v57  ;;  %112 = vst.msk [vmem:[#allocation2 + $0x60] sm:$0xff] %vm99_vm0, %v2297_v57 }
  0x6a   :  { %1890 = vmatpush3.bf16.xpose.msra.mxu0 %v1887_v13  ;;  %1953 = vmatpush3.bf16.xpose.msra.mxu1 %v1887_v13  ;;  %113 = vst.msk [vmem:[#allocation2 + $0x68] sm:$0xff] %vm99_vm0, %v2297_v57  ;;  %114 = vst.msk [vmem:[#allocation2 + $0x70] sm:$0xff] %vm99_vm0, %v2297_v57 }
  0x6b   :  { %1892 = vmatprep.subr.bf16.mxu0 %v1891_v16  ;;  %1946 = vmatprep.subr.bf16.mxu1 %v1891_v16  ;;  %115 = vst.msk [vmem:[#allocation2 + $0x78] sm:$0xff] %vm99_vm0, %v2297_v57  ;;  %132 = vst.msk [vmem:[#allocation4] sm:$0xff] %vm99_vm0, %v2297_v57 }
  0x6c   :  { %133 = vst.msk [vmem:[#allocation4 + $0x8] sm:$0xff] %vm99_vm0, %v2297_v57  ;;  %134 = vst.msk [vmem:[#allocation4 + $0x10] sm:$0xff] %vm99_vm0, %v2297_v57 }
  0x6d   :  { %135 = vst.msk [vmem:[#allocation4 + $0x18] sm:$0xff] %vm99_vm0, %v2297_v57  ;;  %136 = vst.msk [vmem:[#allocation4 + $0x20] sm:$0xff] %vm99_vm0, %v2297_v57 }
  0x6e   :  { %137 = vst.msk [vmem:[#allocation4 + $0x28] sm:$0xff] %vm99_vm0, %v2297_v57  ;;  %138 = vst.msk [vmem:[#allocation4 + $0x30] sm:$0xff] %vm99_vm0, %v2297_v57  ;;  %v2738_v59 = vld [vmem:[#allocation2 + $0x30] sm:$0xff] }
  0x6f   :  { %139 = vst.msk [vmem:[#allocation4 + $0x38] sm:$0xff] %vm99_vm0, %v2297_v57  ;;  %140 = vst.msk [vmem:[#allocation4 + $0x40] sm:$0xff] %vm99_vm0, %v2297_v57 }
  0x70   :  { %141 = vst.msk [vmem:[#allocation4 + $0x48] sm:$0xff] %vm99_vm0, %v2297_v57  ;;  %142 = vst.msk [vmem:[#allocation4 + $0x50] sm:$0xff] %vm99_vm0, %v2297_v57 }
  0x71   :  { %143 = vst.msk [vmem:[#allocation4 + $0x58] sm:$0xff] %vm99_vm0, %v2297_v57  ;;  %144 = vst.msk [vmem:[#allocation4 + $0x60] sm:$0xff] %vm99_vm0, %v2297_v57 }
  0x72   :  { %1894 = vmatpush3.bf16.xpose.msra.mxu0 %v1891_v16  ;;  %1954 = vmatpush3.bf16.xpose.msra.mxu1 %v1891_v16  ;;  %145 = vst.msk [vmem:[#allocation4 + $0x68] sm:$0xff] %vm99_vm0, %v2297_v57  ;;  %146 = vst.msk [vmem:[#allocation4 + $0x70] sm:$0xff] %vm99_vm0, %v2297_v57 }
  0x73   :  { %1896 = vmatprep.subr.bf16.mxu0 %v1895_v19  ;;  %1947 = vmatprep.subr.bf16.mxu1 %v1895_v19  ;;  %147 = vst.msk [vmem:[#allocation4 + $0x78] sm:$0xff] %vm99_vm0, %v2297_v57  ;;  %3591 = vst [vmem:[#allocation36_spill] sm:$0xff] %v2510_v60 }
  0x74   :  { %3594 = vst [vmem:[#allocation37_spill] sm:$0xff] %v3593_v61  ;;  %125 = vst.msk [vmem:[#allocation3 + $0x48] sm:$0xff] %vm99_vm0, %v2299_v32 }
  0x75   :  { %116 = vst.msk [vmem:[#allocation3] sm:$0xff] %vm99_vm0, %v2299_v32  ;;  %117 = vst.msk [vmem:[#allocation3 + $0x8] sm:$0xff] %vm99_vm0, %v2299_v32 }
  0x76   :  { %118 = vst.msk [vmem:[#allocation3 + $0x10] sm:$0xff] %vm99_vm0, %v2299_v32  ;;  %119 = vst.msk [vmem:[#allocation3 + $0x18] sm:$0xff] %vm99_vm0, %v2299_v32 }
  0x77   :  { %120 = vst.msk [vmem:[#allocation3 + $0x20] sm:$0xff] %vm99_vm0, %v2299_v32  ;;  %121 = vst.msk [vmem:[#allocation3 + $0x28] sm:$0xff] %vm99_vm0, %v2299_v32 }
  0x78   :  { %122 = vst.msk [vmem:[#allocation3 + $0x30] sm:$0xff] %vm99_vm0, %v2299_v32  ;;  %123 = vst.msk [vmem:[#allocation3 + $0x38] sm:$0xff] %vm99_vm0, %v2299_v32 }
  0x79   :  { %124 = vst.msk [vmem:[#allocation3 + $0x40] sm:$0xff] %vm99_vm0, %v2299_v32  ;;  %126 = vst.msk [vmem:[#allocation3 + $0x50] sm:$0xff] %vm99_vm0, %v2299_v32 }
  0x7a   :  { %1898 = vmatpush3.bf16.xpose.msra.mxu0 %v1895_v19  ;;  %1955 = vmatpush3.bf16.xpose.msra.mxu1 %v1895_v19  ;;  %127 = vst.msk [vmem:[#allocation3 + $0x58] sm:$0xff] %vm99_vm0, %v2299_v32  ;;  %128 = vst.msk [vmem:[#allocation3 + $0x60] sm:$0xff] %vm99_vm0, %v2299_v32 }
  0x7b   :  { %1900 = vmatprep.subr.bf16.mxu0 %v1899_v22  ;;  %1948 = vmatprep.subr.bf16.mxu1 %v1899_v22  ;;  %129 = vst.msk [vmem:[#allocation3 + $0x68] sm:$0xff] %vm99_vm0, %v2299_v32  ;;  %130 = vst.msk [vmem:[#allocation3 + $0x70] sm:$0xff] %vm99_vm0, %v2299_v32 }
  0x7c   :  { %131 = vst.msk [vmem:[#allocation3 + $0x78] sm:$0xff] %vm99_vm0, %v2299_v32  ;;  %148 = vst.msk [vmem:[#allocation5] sm:$0xff] %vm99_vm0, %v2299_v32 }
  0x7d   :  { %149 = vst.msk [vmem:[#allocation5 + $0x8] sm:$0xff] %vm99_vm0, %v2299_v32  ;;  %150 = vst.msk [vmem:[#allocation5 + $0x10] sm:$0xff] %vm99_vm0, %v2299_v32 }
  0x7e   :  { %151 = vst.msk [vmem:[#allocation5 + $0x18] sm:$0xff] %vm99_vm0, %v2299_v32  ;;  %152 = vst.msk [vmem:[#allocation5 + $0x20] sm:$0xff] %vm99_vm0, %v2299_v32 }
  0x7f   :  { %153 = vst.msk [vmem:[#allocation5 + $0x28] sm:$0xff] %vm99_vm0, %v2299_v32  ;;  %154 = vst.msk [vmem:[#allocation5 + $0x30] sm:$0xff] %vm99_vm0, %v2299_v32 }
  0x80   :  { %155 = vst.msk [vmem:[#allocation5 + $0x38] sm:$0xff] %vm99_vm0, %v2299_v32  ;;  %156 = vst.msk [vmem:[#allocation5 + $0x40] sm:$0xff] %vm99_vm0, %v2299_v32 }
  0x81   :  { %157 = vst.msk [vmem:[#allocation5 + $0x48] sm:$0xff] %vm99_vm0, %v2299_v32  ;;  %158 = vst.msk [vmem:[#allocation5 + $0x50] sm:$0xff] %vm99_vm0, %v2299_v32 }
  0x82   :  { %1902 = vmatpush3.bf16.xpose.msra.mxu0 %v1899_v22  ;;  %1956 = vmatpush3.bf16.xpose.msra.mxu1 %v1899_v22  ;;  %159 = vst.msk [vmem:[#allocation5 + $0x58] sm:$0xff] %vm99_vm0, %v2299_v32  ;;  %160 = vst.msk [vmem:[#allocation5 + $0x60] sm:$0xff] %vm99_vm0, %v2299_v32 }
  0x83   :  { %1904 = vmatprep.subr.bf16.mxu0 %v1903_v25  ;;  %1949 = vmatprep.subr.bf16.mxu1 %v1903_v25  ;;  %161 = vst.msk [vmem:[#allocation5 + $0x68] sm:$0xff] %vm99_vm0, %v2299_v32  ;;  %162 = vst.msk [vmem:[#allocation5 + $0x70] sm:$0xff] %vm99_vm0, %v2299_v32 }
  0x84   :  { %163 = vst.msk [vmem:[#allocation5 + $0x78] sm:$0xff] %vm99_vm0, %v2299_v32 }
  0x8a   :  { %1906 = vmatpush3.bf16.xpose.msra.mxu0 %v1903_v25  ;;  %1957 = vmatpush3.bf16.xpose.msra.mxu1 %v1903_v25 }
  0x8b   :  { %1908 = vmatprep.subr.bf16.mxu0 %v1907_v28  ;;  %1950 = vmatprep.subr.bf16.mxu1 %v1907_v28 }
  0x92   :  { %1910 = vmatpush3.bf16.xpose.msra.mxu0 %v1907_v28  ;;  %1958 = vmatpush3.bf16.xpose.msra.mxu1 %v1907_v28 }
  0x99   :  { %1800 = vmatmul.mubr.f32.vlgmr.msra.gmra.mrb[0].mxu0 %v2422_v33  ;;  %1812 = vmatmul.mubr.f32.vlgmr.msra.gmra.mrb[0].mxu1 %v2425_v34 }
  0x9a   :  { %1802 = vmatprep.mubr.f32.mxu0 %v2428_v35  ;;  %1814 = vmatprep.mubr.f32.mxu1 %v2431_v37 }
  0x9d   :  { %1803 = vmatmul.mubr.f32.gmra.mrb[2].mxu0 %v2436_v41  ;;  %1815 = vmatmul.mubr.f32.gmra.mrb[2].mxu1 %v2439_v42 }
  0x9e   :  { %1805 = vmatprep.mubr.f32.mxu0 %v2444_v43  ;;  %1817 = vmatprep.mubr.f32.mxu1 %v2447_v45  ;;  %v2758_v45 = vld [vmem:[#allocation2 + $0x70] sm:$0xff] }
  0xa1   :  { %1806 = vmatmul.mubr.f32.gmra.mrb[4].mxu0 %v2452_v49  ;;  %1818 = vmatmul.mubr.f32.gmra.mrb[4].mxu1 %v2455_v50 }
  0xa2   :  { %1808 = vmatprep.mubr.f32.mxu0 %v2460_v51  ;;  %1820 = vmatprep.mubr.f32.mxu1 %v2463_v53 }
  0xa5   :  { %1809 = vmatmul.mubr.f32.gmra.mrb[6].mxu0 %v2468_v55  ;;  %1821 = vmatmul.mubr.f32.gmra.mrb[6].mxu1 %v2471_v56  ;;  %v2756_v56 = vld [vmem:[#allocation2 + $0x78] sm:$0xff] }
 0x16c   :  { %v1801_v62 = vpop.f32.mrb[0].mxu0  ;;  %v1813_v63 = vpop.f32.mrb[0].mxu1 }
 0x16d   :  { %v286_v0 = vpop.f32.mrb[1].mxu0  ;;  %v2519_v1 = vsel %vm2513_vm1, %v1813_v63, -1e+30  ;;  %v2523_v2 = vsel %vm2513_vm1, %v1801_v62, -1e+30  ;;  %v326_v3 = vpop.f32.mrb[1].mxu1 }
 0x16e   :  { %417 = vmax.xlane.f32.xlu1 %v2519_v1  ;;  %401 = vmax.xlane.f32.xlu0 %v2523_v2  ;;  %v2533_v8 = vsel %vm2513_vm1, %v286_v0, -1e+30  ;;  %v2543_v16 = vsel %vm2513_vm1, %v326_v3, -1e+30 }
 0x170   :  { %v1804_v4 = vpop.f32.mrb[2].mxu0  ;;  %v1816_v5 = vpop.f32.mrb[2].mxu1 }
 0x171   :  { %v2529_v7 = vsel %vm2513_vm1, %v1804_v4, -1e+30  ;;  %v296_v9 = vpop.f32.mrb[3].mxu0  ;;  %v336_v10 = vpop.f32.mrb[3].mxu1  ;;  %v2539_v13 = vsel %vm2513_vm1, %v1816_v5, -1e+30 }
 0x172   :  { %405 = vmax.xlane.f32.xlu1 %v2529_v7  ;;  %399 = vmax.xlane.f32.xlu0 %v2533_v8  ;;  %v2549_v19 = vsel %vm2513_vm1, %v336_v10, -1e+30  ;;  %v2553_v22 = vsel %vm2513_vm1, %v296_v9, -1e+30  ;;  %v2659_v4 = vld [vmem:[#allocation2 + $0x58] sm:$0xff]  ;;  %v2661_v5 = vld [vmem:[#allocation2 + $0x40] sm:$0xff] }
 0x173   :  { %v2719_v9 = vld [vmem:[#allocation2 + $0x60] sm:$0xff] }
 0x174   :  { %v1807_v14 = vpop.f32.mrb[4].mxu0  ;;  %v1819_v15 = vpop.f32.mrb[4].mxu1 }
 0x175   :  { %v306_v17 = vpop.f32.mrb[5].mxu0  ;;  %v346_v18 = vpop.f32.mrb[5].mxu1  ;;  %v2559_v25 = vsel %vm2513_vm1, %v1807_v14, -1e+30  ;;  %v2569_v27 = vsel %vm2513_vm1, %v1819_v15, -1e+30 }
 0x176   :  { %421 = vmax.xlane.f32.xlu1 %v2539_v13  ;;  %415 = vmax.xlane.f32.xlu0 %v2543_v16  ;;  %v2563_v26 = vsel %vm2513_vm1, %v306_v17, -1e+30  ;;  %v2573_v28 = vsel %vm2513_vm1, %v346_v18, -1e+30 }
 0x178   :  { %v1810_v20 = vpop.f32.mrb[6].mxu0  ;;  %v1822_v21 = vpop.f32.mrb[6].mxu1 }
 0x179   :  { %v316_v23 = vpop.f32.mrb[7].mxu0  ;;  %v356_v24 = vpop.f32.mrb[7].mxu1  ;;  %v2579_v30 = vsel %vm2513_vm1, %v1810_v20, -1e+30  ;;  %v2621_v36 = vsel %vm2513_vm1, %v1822_v21, -1e+30 }
 0x17a   :  { %403 = vmax.xlane.f32.xlu1 %v2553_v22  ;;  %419 = vmax.xlane.f32.xlu0 %v2549_v19  ;;  %v2583_v31 = vsel %vm2513_vm1, %v316_v23, -1e+30  ;;  %v2625_v38 = vsel %vm2513_vm1, %v356_v24, -1e+30  ;;  %v2678_v20 = vld [vmem:[#allocation2 + $0x10] sm:$0xff] }
 0x17b   :  { %v2680_v21 = vld [vmem:[#allocation2 + $0x50] sm:$0xff] }
 0x17e   :  { %409 = vmax.xlane.f32.xlu1 %v2559_v25  ;;  %407 = vmax.xlane.f32.xlu0 %v2563_v26 }
 0x182   :  { %425 = vmax.xlane.f32.xlu1 %v2569_v27  ;;  %423 = vmax.xlane.f32.xlu0 %v2573_v28 }
 0x186   :  { %413 = vmax.xlane.f32.xlu1 %v2579_v30  ;;  %411 = vmax.xlane.f32.xlu0 %v2583_v31 }
 0x18a   :  { %429 = vmax.xlane.f32.xlu1 %v2621_v36  ;;  %427 = vmax.xlane.f32.xlu0 %v2625_v38 }
 0x1fb   :  { %v418_v44 = vpop.xlane.xlu1 %417  ;;  %v402_v46 = vpop.xlane.xlu0 %401 }
 0x1fc   :  { %v2634_v47 = vmax.f32 %v2629_v39, %v418_v44  ;;  %v2637_v48 = vmax.f32 %v2631_v40, %v402_v46 }
 0x1fe   :  { %729 = vst.msk [vmem:[#allocation2 + $0x48] sm:$0xff] %vm99_vm0, %v2634_v47  ;;  %721 = vst.msk [vmem:[#allocation2 + $0x8] sm:$0xff] %vm99_vm0, %v2637_v48  ;;  %534 = vperm.xlu1 %1986, %v2637_v48   ;;  %574 = vperm.xlu0 %1987, %v2634_v47  }
 0x1ff   :  { %v406_v62 = vpop.xlane.xlu1 %405  ;;  %v400_v63 = vpop.xlane.xlu0 %399 }
 0x200   :  { %v2654_v0 = vmax.f32 %v2639_v52, %v406_v62  ;;  %v2657_v3 = vmax.f32 %v2641_v54, %v400_v63  ;;  %v2698_v62 = vld [vmem:[#allocation2 + $0x28] sm:$0xff]  ;;  %v2700_v63 = vld [vmem:[#allocation2 + $0x20] sm:$0xff] }
 0x202   :  { %723 = vst.msk [vmem:[#allocation2 + $0x18] sm:$0xff] %vm99_vm0, %v2654_v0  ;;  %720 = vst.msk [vmem:[#allocation2] sm:$0xff] %vm99_vm0, %v2657_v3  ;;  %529 = vperm.xlu0 %1987, %v2657_v3  }
 0x203   :  { %v422_v14 = vpop.xlane.xlu1 %421  ;;  %v416_v15 = vpop.xlane.xlu0 %415 }
 0x204   :  { %v2673_v17 = vmax.f32 %v2659_v4, %v422_v14  ;;  %v2676_v18 = vmax.f32 %v2661_v5, %v416_v15  ;;  %v2717_v14 = vld [vmem:[#allocation2 + $0x68] sm:$0xff]  ;;  %v2736_v15 = vld [vmem:[#allocation2 + $0x38] sm:$0xff] }
 0x206   :  { %731 = vst.msk [vmem:[#allocation2 + $0x58] sm:$0xff] %vm99_vm0, %v2673_v17  ;;  %728 = vst.msk [vmem:[#allocation2 + $0x40] sm:$0xff] %vm99_vm0, %v2676_v18  ;;  %584 = vperm.xlu0 %1987, %v2673_v17   ;;  %569 = vperm.xlu1 %1986, %v2676_v18  }
 0x207   :  { %v404_v29 = vpop.xlane.xlu1 %403  ;;  %v420_v32 = vpop.xlane.xlu0 %419 }
 0x208   :  { %v2693_v44 = vmax.f32 %v2678_v20, %v404_v29  ;;  %v2696_v46 = vmax.f32 %v2680_v21, %v420_v32 }
 0x20a   :  { %722 = vst.msk [vmem:[#allocation2 + $0x10] sm:$0xff] %vm99_vm0, %v2693_v44  ;;  %730 = vst.msk [vmem:[#allocation2 + $0x50] sm:$0xff] %vm99_vm0, %v2696_v46  ;;  %544 = vperm.xlu1 %1986, %v2654_v0  }
 0x20b   :  { %v410_v29 = vpop.xlane.xlu1 %409  ;;  %v408_v32 = vpop.xlane.xlu0 %407 }
 0x20c   :  { %v2712_v58 = vmax.f32 %v2698_v62, %v410_v29  ;;  %v2715_v23 = vmax.f32 %v2700_v63, %v408_v32 }
 0x20e   :  { %725 = vst.msk [vmem:[#allocation2 + $0x28] sm:$0xff] %vm99_vm0, %v2712_v58  ;;  %539 = vperm.xlu1 %1986, %v2693_v44   ;;  %724 = vst.msk [vmem:[#allocation2 + $0x20] sm:$0xff] %vm99_vm0, %v2715_v23 }
 0x20f   :  { %v426_v29 = vpop.xlane.xlu1 %425  ;;  %v424_v32 = vpop.xlane.xlu0 %423 }
 0x210   :  { %v2731_v10 = vmax.f32 %v2717_v14, %v426_v29  ;;  %v2734_v57 = vmax.f32 %v2719_v9, %v424_v32 }
 0x212   :  { %733 = vst.msk [vmem:[#allocation2 + $0x68] sm:$0xff] %vm99_vm0, %v2731_v10  ;;  %594 = vperm.xlu0 %1987, %v2731_v10   ;;  %579 = vperm.xlu1 %1986, %v2696_v46   ;;  %732 = vst.msk [vmem:[#allocation2 + $0x60] sm:$0xff] %vm99_vm0, %v2734_v57 }
 0x213   :  { %v414_v32 = vpop.xlane.xlu1 %413  ;;  %v412_v24 = vpop.xlane.xlu0 %411 }
 0x214   :  { %v2751_v53 = vmax.f32 %v2736_v15, %v414_v32  ;;  %v2754_v60 = vmax.f32 %v2738_v59, %v412_v24 }
 0x216   :  { %727 = vst.msk [vmem:[#allocation2 + $0x38] sm:$0xff] %vm99_vm0, %v2751_v53  ;;  %554 = vperm.xlu1 %1986, %v2712_v58   ;;  %726 = vst.msk [vmem:[#allocation2 + $0x30] sm:$0xff] %vm99_vm0, %v2754_v60 }
 0x217   :  { %v430_v24 = vpop.xlane.xlu1 %429  ;;  %v428_v32 = vpop.xlane.xlu0 %427 }
 0x218   :  { %v2770_v37 = vmax.f32 %v2756_v56, %v430_v24  ;;  %v2773_v42 = vmax.f32 %v2758_v45, %v428_v32 }
 0x21a   :  { %735 = vst.msk [vmem:[#allocation2 + $0x78] sm:$0xff] %vm99_vm0, %v2770_v37  ;;  %604 = vperm.xlu0 %1987, %v2770_v37   ;;  %549 = vperm.xlu1 %1986, %v2715_v23   ;;  %734 = vst.msk [vmem:[#allocation2 + $0x70] sm:$0xff] %vm99_vm0, %v2773_v42 }
 0x21e   :  { %589 = vperm.xlu1 %1986, %v2734_v57  }
 0x222   :  { %564 = vperm.xlu1 %1986, %v2751_v53  }
 0x226   :  { %559 = vperm.xlu1 %1986, %v2754_v60  }
 0x22a   :  { %599 = vperm.xlu1 %1986, %v2773_v42  }
 0x27d   :  { %v535_v24 = vpop.permute.xlu1 %534  ;;  %v575_v32 = vpop.permute.xlu0 %574 }
 0x27e   :  { %v608_v50 = vsub.f32 %v2523_v2, %v535_v24  ;;  %v616_v12 = vsub.f32 %v2519_v1, %v575_v32 }
 0x280   :  { %v625_v34 = vmul.f32 1.442695, %v608_v50  ;;  %v641_v51 = vmul.f32 1.442695, %v616_v12 }
 0x281   :  { %v530_v29 = vpop.permute.xlu0 %529 }
 0x282   :  { %1988 = vpow2.f32 %v625_v34  ;;  %v607_v55 = vsub.f32 %v2533_v8, %v530_v29 }
 0x283   :  { %1990 = vpow2.f32 %v641_v51 }
 0x284   :  { %v623_v43 = vmul.f32 1.442695, %v607_v55 }
 0x285   :  { %v570_v49 = vpop.permute.xlu1 %569  ;;  %v585_v41 = vpop.permute.xlu0 %584 }
 0x286   :  { %1992 = vpow2.f32 %v623_v43  ;;  %v615_v33 = vsub.f32 %v2543_v16, %v570_v49  ;;  %v618_v35 = vsub.f32 %v2539_v13, %v585_v41 }
 0x288   :  { %v639_v11 = vmul.f32 1.442695, %v615_v33  ;;  %v645_v34 = vmul.f32 1.442695, %v618_v35 }
 0x289   :  { %v545_v61 = vpop.permute.xlu1 %544 }
 0x28a   :  { %1994 = vpow2.f32 %v639_v11  ;;  %v610_v1 = vsub.f32 %v2529_v7, %v545_v61 }
 0x28c   :  { %v1989_v50 = vpop.eup %1988  ;;  %v629_v12 = vmul.f32 1.442695, %v610_v1 }
 0x28d   :  { %v1991_v2 = vpop.eup %1990  ;;  %657 = vadd.xlane.f32.xlu0 %v1989_v50  ;;  %v540_v8 = vpop.permute.xlu1 %539 }
 0x28e   :  { %1996 = vpow2.f32 %v629_v12  ;;  %v609_v51 = vsub.f32 %v2553_v22, %v540_v8  ;;  %673 = vadd.xlane.f32.xlu1 %v1991_v2 }
 0x28f   :  { %1998 = vpow2.f32 %v645_v34 }
 0x290   :  { %v1993_v43 = vpop.eup %1992  ;;  %v627_v49 = vmul.f32 1.442695, %v609_v51 }
 0x291   :  { %v580_v33 = vpop.permute.xlu1 %579  ;;  %v595_v11 = vpop.permute.xlu0 %594 }
 0x292   :  { %2000 = vpow2.f32 %v627_v49  ;;  %v617_v41 = vsub.f32 %v2549_v19, %v580_v33  ;;  %655 = vadd.xlane.f32.xlu1 %v1993_v43  ;;  %v620_v7 = vsub.f32 %v2569_v27, %v595_v11 }
 0x294   :  { %v1995_v55 = vpop.eup %1994  ;;  %v643_v61 = vmul.f32 1.442695, %v617_v41  ;;  %v649_v29 = vmul.f32 1.442695, %v620_v7 }
 0x295   :  { %671 = vadd.xlane.f32.xlu0 %v1995_v55  ;;  %v555_v35 = vpop.permute.xlu1 %554 }
 0x296   :  { %2002 = vpow2.f32 %v643_v61  ;;  %v612_v13 = vsub.f32 %v2559_v25, %v555_v35 }
 0x298   :  { %v1997_v16 = vpop.eup %1996  ;;  %v633_v22 = vmul.f32 1.442695, %v612_v13 }
 0x299   :  { %v550_v24 = vpop.permute.xlu1 %549  ;;  %661 = vadd.xlane.f32.xlu1 %v1997_v16  ;;  %v1999_v19 = vpop.eup %1998 }
 0x29a   :  { %2004 = vpow2.f32 %v633_v22  ;;  %v611_v32 = vsub.f32 %v2563_v26, %v550_v24  ;;  %v605_v27 = vpop.permute.xlu0 %604 }
 0x29b   :  { %2006 = vpow2.f32 %v649_v29  ;;  %v622_v8 = vsub.f32 %v2621_v36, %v605_v27  ;;  %v3595_v29 = vsub.f32 %v2631_v40, %v2637_v48  ;;  %v3599_v27 = vsub.f32 %v2639_v52, %v2654_v0 }
 0x29c   :  { %v2001_v1 = vpop.eup %2000  ;;  %v631_v50 = vmul.f32 1.442695, %v611_v32  ;;  %v3596_v32 = vsub.f32 %v2629_v39, %v2634_v47  ;;  %v3600_v47 = vsub.f32 %v2659_v4, %v2673_v17 }
 0x29d   :  { %659 = vadd.xlane.f32.xlu0 %v2001_v1  ;;  %v590_v12 = vpop.permute.xlu1 %589  ;;  %677 = vadd.xlane.f32.xlu1 %v1999_v19  ;;  %v653_v33 = vmul.f32 1.442695, %v622_v8  ;;  %v481_v24 = vmul.f32 1.442695, %v3595_v29  ;;  %v3597_v19 = vsub.f32 %v2641_v54, %v2657_v3  ;;  %v485_v40 = vmul.f32 1.442695, %v3599_v27 }
 0x29e   :  { %2008 = vpow2.f32 %v631_v50  ;;  %v619_v2 = vsub.f32 %v2573_v28, %v590_v12  ;;  %v3598_v50 = vsub.f32 %v2661_v5, %v2676_v18  ;;  %v3601_v54 = vsub.f32 %v2678_v20, %v2693_v44  ;;  %v455_v44 = vld [vmem:[#allocation3 + $0x40] sm:$0xff]  ;;  %v449_v29 = vld [vmem:[#allocation3 + $0x10] sm:$0xff] }
 0x29f   :  { %v479_v1 = vmul.f32 1.442695, %v3597_v19  ;;  %v3607_v27 = vsub.f32 %v2736_v15, %v2751_v53 }
 0x2a0   :  { %v2003_v25 = vpop.eup %2002  ;;  %v647_v34 = vmul.f32 1.442695, %v619_v2  ;;  %v495_v12 = vmul.f32 1.442695, %v3598_v50  ;;  %v448_v2 = vld [vmem:[#allocation3 + $0x8] sm:$0xff] }
 0x2a1   :  { %675 = vadd.xlane.f32.xlu0 %v2003_v25  ;;  %v565_v51 = vpop.permute.xlu1 %564  ;;  %v501_v25 = vmul.f32 1.442695, %v3600_v47  ;;  %v483_v3 = vmul.f32 1.442695, %v3601_v54 }
 0x2a2   :  { %2010 = vpow2.f32 %v647_v34  ;;  %v614_v26 = vsub.f32 %v2579_v30, %v565_v51  ;;  %v456_v34 = vld [vmem:[#allocation3 + $0x48] sm:$0xff] }
 0x2a4   :  { %v2005_v43 = vpop.eup %2004  ;;  %v637_v49 = vmul.f32 1.442695, %v614_v26  ;;  %v447_v26 = vld [vmem:[#allocation3] sm:$0xff] }
 0x2a5   :  { %v560_v41 = vpop.permute.xlu1 %559  ;;  %665 = vadd.xlane.f32.xlu1 %v2005_v43  ;;  %v2007_v55 = vpop.eup %2006  ;;  %v3602_v43 = vsub.f32 %v2680_v21, %v2696_v46  ;;  %v450_v46 = vld [vmem:[#allocation3 + $0x18] sm:$0xff] }
 0x2a6   :  { %2012 = vpow2.f32 %v637_v49  ;;  %v613_v11 = vsub.f32 %v2583_v31, %v560_v41  ;;  %v3603_v41 = vsub.f32 %v2698_v62, %v2712_v58 }
 0x2a7   :  { %2014 = vpow2.f32 %v653_v33  ;;  %v499_v4 = vmul.f32 1.442695, %v3602_v43  ;;  %v459_v43 = vld [vmem:[#allocation3 + $0x60] sm:$0xff] }
 0x2a8   :  { %v2009_v61 = vpop.eup %2008  ;;  %v635_v28 = vmul.f32 1.442695, %v613_v11  ;;  %v489_v11 = vmul.f32 1.442695, %v3603_v41 }
 0x2a9   :  { %663 = vadd.xlane.f32.xlu0 %v2009_v61  ;;  %v600_v7 = vpop.permute.xlu1 %599  ;;  %681 = vadd.xlane.f32.xlu1 %v2007_v55 }
 0x2aa   :  { %2016 = vpow2.f32 %v635_v28  ;;  %v621_v36 = vsub.f32 %v2625_v38, %v600_v7  ;;  %v497_v38 = vmul.f32 1.442695, %v3596_v32  ;;  %v3604_v7 = vsub.f32 %v2700_v63, %v2715_v23 }
 0x2ab   :  { %v3606_v23 = vsub.f32 %v2719_v9, %v2734_v57 }
 0x2ac   :  { %v2011_v35 = vpop.eup %2010  ;;  %v651_v30 = vmul.f32 1.442695, %v621_v36  ;;  %v487_v36 = vmul.f32 1.442695, %v3604_v7 }
 0x2ad   :  { %679 = vadd.xlane.f32.xlu0 %v2011_v35  ;;  %v503_v63 = vmul.f32 1.442695, %v3606_v23  ;;  %v775_v23 = vld [vmem:[#allocation13 + $0x10] sm:$0xff] (!%p1702_p9) }
 0x2ae   :  { %2018 = vpow2.f32 %v651_v30  ;;  %v3605_v30 = vsub.f32 %v2717_v14, %v2731_v10 }
 0x2af   :  { %2020 = vpow2.f32 %v481_v24 }
 0x2b0   :  { %v2013_v13 = vpop.eup %2012  ;;  %2022 = vpow2.f32 %v497_v38 }
 0x2b1   :  { %669 = vadd.xlane.f32.xlu1 %v2013_v13  ;;  %v2015_v16 = vpop.eup %2014  ;;  %2024 = vpow2.f32 %v479_v1  ;;  %v505_v13 = vmul.f32 1.442695, %v3605_v30  ;;  %v457_v1 = vld [vmem:[#allocation3 + $0x50] sm:$0xff] }
 0x2b2   :  { %2026 = vpow2.f32 %v495_v12 }
 0x2b3   :  { %2028 = vpow2.f32 %v485_v40  ;;  %v493_v40 = vmul.f32 1.442695, %v3607_v27 }
 0x2b4   :  { %v2017_v22 = vpop.eup %2016  ;;  %2030 = vpow2.f32 %v501_v25 }
 0x2b5   :  { %667 = vadd.xlane.f32.xlu0 %v2017_v22  ;;  %685 = vadd.xlane.f32.xlu1 %v2015_v16  ;;  %2032 = vpow2.f32 %v483_v3 }
 0x2b6   :  { %2034 = vpow2.f32 %v499_v4 }
 0x2b7   :  { %2036 = vpow2.f32 %v489_v11 }
 0x2b8   :  { %v2019_v31 = vpop.eup %2018  ;;  %2038 = vpow2.f32 %v487_v36 }
 0x2b9   :  { %683 = vadd.xlane.f32.xlu0 %v2019_v31  ;;  %v2021_v48 = vpop.eup %2020  ;;  %v458_v31 = vld [vmem:[#allocation3 + $0x58] sm:$0xff]  ;;  %2040 = vpow2.f32 %v505_v13  ;;  %v461_v13 = vld [vmem:[#allocation3 + $0x70] sm:$0xff] }
 0x2ba   :  { %v2023_v39 = vpop.eup %2022  ;;  %v512_v5 = vmul.f32 %v2021_v48, %v448_v2  ;;  %2042 = vpow2.f32 %v503_v63  ;;  %v452_v2 = vld [vmem:[#allocation3 + $0x28] sm:$0xff] }
 0x2bb   :  { %v520_v18 = vmul.f32 %v2023_v39, %v456_v34  ;;  %v2025_v51 = vpop.eup %2024  ;;  %v3608_v39 = vsub.f32 %v2738_v59, %v2754_v60  ;;  %2044 = vpow2.f32 %v493_v40  ;;  %v3609_v34 = vsub.f32 %v2756_v56, %v2770_v37  ;;  %v779_v40 = vld [vmem:[#allocation13 + $0x30] sm:$0xff] (!%p1702_p9) }
 0x2bc   :  { %v2027_v49 = vpop.eup %2026  ;;  %v511_v20 = vmul.f32 %v2025_v51, %v447_v26  ;;  %v3610_v60 = vsub.f32 %v2758_v45, %v2773_v42  ;;  %v454_v42 = vld [vmem:[#allocation3 + $0x38] sm:$0xff] }
 0x2bd   :  { %v519_v61 = vmul.f32 %v2027_v49, %v455_v44  ;;  %v2029_v28 = vpop.eup %2028  ;;  %v491_v47 = vmul.f32 1.442695, %v3608_v39  ;;  %v509_v53 = vmul.f32 1.442695, %v3609_v34 }
 0x2be   :  { %v2031_v16 = vpop.eup %2030  ;;  %v514_v58 = vmul.f32 %v2029_v28, %v450_v46  ;;  %v507_v59 = vmul.f32 1.442695, %v3610_v60  ;;  %v453_v28 = vld [vmem:[#allocation3 + $0x30] sm:$0xff] }
 0x2bf   :  { %v2033_v62 = vpop.eup %2032  ;;  %v522_v32 = vmul.f32 %v2031_v16, %v458_v31  ;;  %2046 = vpow2.f32 %v491_v47  ;;  %v783_v47 = vld [vmem:[#allocation13 + $0x50] sm:$0xff] (!%p1702_p9) }
 0x2c0   :  { %v513_v10 = vmul.f32 %v2033_v62, %v449_v29  ;;  %v2035_v14 = vpop.eup %2034  ;;  %2048 = vpow2.f32 %v509_v53  ;;  %v773_v29 = vld [vmem:[#allocation13] sm:$0xff] (!%p1702_p9)  ;;  %v743_v60 = vld [vmem:[#allocation11 + $0x10] sm:$0xff] (!%p1702_p9) }
 0x2c1   :  { %v521_v57 = vmul.f32 %v2035_v14, %v457_v1  ;;  %v2037_v9 = vpop.eup %2036  ;;  %2050 = vpow2.f32 %v507_v59  ;;  %v741_v14 = vld [vmem:[#allocation11] sm:$0xff] (!%p1702_p9)  ;;  %v778_v1 = vld [vmem:[#allocation13 + $0x28] sm:$0xff] (!%p1702_p9)  ;;  %v751_v59 = vld [vmem:[#allocation11 + $0x50] sm:$0xff] (!%p1702_p9) }
 0x2c2   :  { %v2039_v15 = vpop.eup %2038  ;;  %v516_v54 = vmul.f32 %v2037_v9, %v452_v2  ;;  %v782_v2 = vld [vmem:[#allocation13 + $0x48] sm:$0xff] (!%p1702_p9)  ;;  %v785_v53 = vld [vmem:[#allocation13 + $0x60] sm:$0xff] (!%p1702_p9) }
 0x2c3   :  { %v2041_v3 = vpop.eup %2040 }
 0x2c4   :  { %v2043_v56 = vpop.eup %2042 }
 0x2c5   :  { %v523_v49 = vmul.f32 %v2043_v56, %v459_v43  ;;  %v759_v56 = vmul.f32 (!%p1702_p9), %v743_v60, %v2411_v6  ;;  %v752_v43 = vld [vmem:[#allocation11 + $0x58] sm:$0xff] (!%p1702_p9) }
 0x31a   :  { %v658_v8 = vpop.xlane.xlu0 %657 }
 0x31b   :  { %v674_v52 = vpop.xlane.xlu1 %673  ;;  %v688_v0 = vadd.f32 %v658_v8, %v512_v5  ;;  %v451_v8 = vld [vmem:[#allocation3 + $0x20] sm:$0xff] }
 0x31c   :  { %v696_v17 = vadd.f32 %v674_v52, %v520_v18  ;;  %v460_v18 = vld [vmem:[#allocation3 + $0x68] sm:$0xff]  ;;  %v515_v37 = vmul.f32 %v2039_v15, %v451_v8 }
 0x31d   :  { %705 = vst.msk [vmem:[#allocation3 + $0x8] sm:$0xff] %vm99_vm0, %v688_v0  ;;  %v524_v52 = vmul.f32 %v2041_v3, %v460_v18  ;;  %v786_v15 = vld [vmem:[#allocation13 + $0x68] sm:$0xff] (!%p1702_p9)  ;;  %v787_v3 = vld [vmem:[#allocation13 + $0x70] sm:$0xff] (!%p1702_p9) }
 0x31e   :  { %713 = vst.msk [vmem:[#allocation3 + $0x48] sm:$0xff] %vm99_vm0, %v696_v17  ;;  %v742_v8 = vld [vmem:[#allocation11 + $0x8] sm:$0xff] (!%p1702_p9) }
 0x31f   :  { %v656_v33 = vpop.xlane.xlu1 %655 }
 0x320   :  { %v687_v55 = vadd.f32 %v656_v33, %v511_v20  ;;  %v2045_v20 = vpop.eup %2044 }
 0x321   :  { %v2047_v33 = vpop.eup %2046  ;;  %v518_v41 = vmul.f32 %v2045_v20, %v454_v42  ;;  %v768_v20 = vmul.f32 (!%p1702_p9), %v752_v43, %v2411_v6  ;;  %v746_v42 = vld [vmem:[#allocation11 + $0x28] sm:$0xff] (!%p1702_p9) }
 0x322   :  { %704 = vst.msk [vmem:[#allocation3] sm:$0xff] %vm99_vm0, %v687_v55  ;;  %v672_v21 = vpop.xlane.xlu0 %671  ;;  %v2049_v11 = vpop.eup %2048  ;;  %v517_v7 = vmul.f32 %v2047_v33, %v453_v28  ;;  %v754_v33 = vld [vmem:[#allocation11 + $0x68] sm:$0xff] (!%p1702_p9) }
 0x323   :  { %v695_v35 = vadd.f32 %v672_v21, %v519_v61  ;;  %v462_v61 = vld [vmem:[#allocation3 + $0x78] sm:$0xff]  ;;  %v2051_v36 = vpop.eup %2050 }
 0x324   :  { %v526_v46 = vmul.f32 %v2049_v11, %v462_v61  ;;  %v525_v62 = vmul.f32 %v2051_v36, %v461_v13  ;;  %v755_v11 = vld [vmem:[#allocation11 + $0x70] sm:$0xff] (!%p1702_p9)  ;;  %v770_v61 = vmul.f32 (!%p1702_p9), %v754_v33, %v2411_v6 }
 0x325   :  { %712 = vst.msk [vmem:[#allocation3 + $0x40] sm:$0xff] %vm99_vm0, %v695_v35 }
 0x326   :  { %v662_v22 = vpop.xlane.xlu1 %661 }
 0x327   :  { %v690_v24 = vadd.f32 %v662_v22, %v514_v58 }
 0x329   :  { %707 = vst.msk [vmem:[#allocation3 + $0x18] sm:$0xff] %vm99_vm0, %v690_v24  ;;  %v774_v24 = vld [vmem:[#allocation13 + $0x8] sm:$0xff] (!%p1702_p9) }
 0x32a   :  { %v678_v38 = vpop.xlane.xlu1 %677  ;;  %v660_v19 = vpop.xlane.xlu0 %659  ;;  %v1911_v63 = vpack.c.bf16 (!%p1702_p9), %v774_v24, %v773_v29 }
 0x32b   :  { %v698_v50 = vadd.f32 %v678_v38, %v522_v32  ;;  %v689_v12 = vadd.f32 %v660_v19, %v513_v10  ;;  %v776_v32 = vld [vmem:[#allocation13 + $0x18] sm:$0xff] (!%p1702_p9)  ;;  %v749_v38 = vld [vmem:[#allocation11 + $0x40] sm:$0xff] (!%p1702_p9) }
 0x32c   :  { %v1915_v10 = vpack.c.bf16 (!%p1702_p9), %v776_v32, %v775_v23  ;;  %1912 = vmatprep.subr.bf16.mxu0 (!%p1702_p9), %v1911_v63  ;;  %1959 = vmatprep.subr.bf16.mxu1 (!%p1702_p9), %v1911_v63  ;;  %v777_v19 = vld [vmem:[#allocation13 + $0x20] sm:$0xff] (!%p1702_p9) }
 0x32d   :  { %715 = vst.msk [vmem:[#allocation3 + $0x58] sm:$0xff] %vm99_vm0, %v698_v50  ;;  %706 = vst.msk [vmem:[#allocation3 + $0x10] sm:$0xff] %vm99_vm0, %v689_v12  ;;  %1914 = vmatpush3.bf16.xpose.msra.mxu0 (!%p1702_p9), %v1911_v63  ;;  %1967 = vmatpush3.bf16.xpose.msra.mxu1 (!%p1702_p9), %v1911_v63  ;;  %v757_v50 = vmul.f32 (!%p1702_p9), %v741_v14, %v2411_v6  ;;  %v765_v12 = vmul.f32 (!%p1702_p9), %v749_v38, %v2411_v6 }
 0x32e   :  { %v676_v48 = vpop.xlane.xlu0 %675  ;;  %1916 = vmatprep.subr.bf16.mxu0 (!%p1702_p9), %v1915_v10  ;;  %1960 = vmatprep.subr.bf16.mxu1 (!%p1702_p9), %v1915_v10  ;;  %v1919_v27 = vpack.c.bf16 (!%p1702_p9), %v778_v1, %v777_v19 }
 0x32f   :  { %v697_v25 = vadd.f32 %v676_v48, %v521_v57  ;;  %1855 = vmatprep.mubr.f32.mxu0 (!%p1702_p9), %v757_v50  ;;  %1867 = vmatprep.mubr.f32.mxu1 (!%p1702_p9), %v765_v12  ;;  %v780_v57 = vld [vmem:[#allocation13 + $0x38] sm:$0xff] (!%p1702_p9)  ;;  %v781_v48 = vld [vmem:[#allocation13 + $0x40] sm:$0xff] (!%p1702_p9) }
 0x330   :  { %v1923_v9 = vpack.c.bf16 (!%p1702_p9), %v780_v57, %v779_v40  ;;  %v1927_v39 = vpack.c.bf16 (!%p1702_p9), %v782_v2, %v781_v48 }
 0x331   :  { %714 = vst.msk [vmem:[#allocation3 + $0x50] sm:$0xff] %vm99_vm0, %v697_v25  ;;  %v784_v25 = vld [vmem:[#allocation13 + $0x58] sm:$0xff] (!%p1702_p9) }
 0x332   :  { %v666_v5 = vpop.xlane.xlu1 %665  ;;  %v1931_v34 = vpack.c.bf16 (!%p1702_p9), %v784_v25, %v783_v47 }
 0x333   :  { %v692_v51 = vadd.f32 %v666_v5, %v516_v54  ;;  %v1935_v54 = vpack.c.bf16 (!%p1702_p9), %v786_v15, %v785_v53  ;;  %v788_v5 = vld [vmem:[#allocation13 + $0x78] sm:$0xff] (!%p1702_p9) }
 0x334   :  { %v1939_v18 = vpack.c.bf16 (!%p1702_p9), %v788_v5, %v787_v3  ;;  %v2966_v5 = vld [vmem:[#allocation4 + $0x48] sm:$0xff] (!%p1702_p9) }
 0x335   :  { %709 = vst.msk [vmem:[#allocation3 + $0x28] sm:$0xff] %vm99_vm0, %v692_v51  ;;  %1918 = vmatpush3.bf16.xpose.msra.mxu0 (!%p1702_p9), %v1915_v10  ;;  %1968 = vmatpush3.bf16.xpose.msra.mxu1 (!%p1702_p9), %v1915_v10  ;;  %v750_v51 = vld [vmem:[#allocation11 + $0x48] sm:$0xff] (!%p1702_p9) }
 0x336   :  { %v682_v0 = vpop.xlane.xlu1 %681  ;;  %v664_v26 = vpop.xlane.xlu0 %663  ;;  %1920 = vmatprep.subr.bf16.mxu0 (!%p1702_p9), %v1919_v27  ;;  %1961 = vmatprep.subr.bf16.mxu1 (!%p1702_p9), %v1919_v27 }
 0x337   :  { %v700_v4 = vadd.f32 %v682_v0, %v524_v52  ;;  %v691_v17 = vadd.f32 %v664_v26, %v515_v37  ;;  %v758_v52 = vmul.f32 (!%p1702_p9), %v742_v8, %v2411_v6  ;;  %v766_v37 = vmul.f32 (!%p1702_p9), %v750_v51, %v2411_v6  ;;  %v744_v0 = vld [vmem:[#allocation11 + $0x18] sm:$0xff] (!%p1702_p9) }
 0x338   :  { %v767_v26 = vmul.f32 (!%p1702_p9), %v751_v59, %v2411_v6 }
 0x339   :  { %717 = vst.msk [vmem:[#allocation3 + $0x68] sm:$0xff] %vm99_vm0, %v700_v4  ;;  %708 = vst.msk [vmem:[#allocation3 + $0x20] sm:$0xff] %vm99_vm0, %v691_v17  ;;  %v745_v4 = vld [vmem:[#allocation11 + $0x20] sm:$0xff] (!%p1702_p9) }
 0x33a   :  { %v680_v44 = vpop.xlane.xlu0 %679  ;;  %v753_v17 = vld [vmem:[#allocation11 + $0x60] sm:$0xff] (!%p1702_p9) }
 0x33b   :  { %v699_v45 = vadd.f32 %v680_v44, %v523_v49  ;;  %v760_v49 = vmul.f32 (!%p1702_p9), %v744_v0, %v2411_v6  ;;  %v761_v44 = vmul.f32 (!%p1702_p9), %v745_v4, %v2411_v6 }
 0x33d   :  { %716 = vst.msk [vmem:[#allocation3 + $0x60] sm:$0xff] %vm99_vm0, %v699_v45  ;;  %1922 = vmatpush3.bf16.xpose.msra.mxu0 (!%p1702_p9), %v1919_v27  ;;  %1969 = vmatpush3.bf16.xpose.msra.mxu1 (!%p1702_p9), %v1919_v27  ;;  %v769_v45 = vmul.f32 (!%p1702_p9), %v753_v17, %v2411_v6 }
 0x33e   :  { %v670_v55 = vpop.xlane.xlu1 %669  ;;  %1924 = vmatprep.subr.bf16.mxu0 (!%p1702_p9), %v1923_v9  ;;  %1962 = vmatprep.subr.bf16.mxu1 (!%p1702_p9), %v1923_v9 }
 0x33f   :  { %v694_v21 = vadd.f32 %v670_v55, %v518_v41  ;;  %v747_v41 = vld [vmem:[#allocation11 + $0x30] sm:$0xff] (!%p1702_p9)  ;;  %v762_v55 = vmul.f32 (!%p1702_p9), %v746_v42, %v2411_v6 }
 0x340   :  { %v763_v28 = vmul.f32 (!%p1702_p9), %v747_v41, %v2411_v6 }
 0x341   :  { %711 = vst.msk [vmem:[#allocation3 + $0x38] sm:$0xff] %vm99_vm0, %v694_v21  ;;  %v748_v21 = vld [vmem:[#allocation11 + $0x38] sm:$0xff] (!%p1702_p9) }
 0x342   :  { %v686_v35 = vpop.xlane.xlu1 %685  ;;  %v668_v30 = vpop.xlane.xlu0 %667  ;;  %v764_v36 = vmul.f32 (!%p1702_p9), %v748_v21, %v2411_v6 }
 0x343   :  { %v702_v16 = vadd.f32 %v686_v35, %v526_v46  ;;  %v693_v58 = vadd.f32 %v668_v30, %v517_v7  ;;  %740 = sbr.rel (%p1702_p9) target bundleno = 1565 (0x61d), region = 53  ;;  %v771_v46 = vmul.f32 (!%p1702_p9), %v755_v11, %v2411_v6  ;;  %v756_v7 = vld [vmem:[#allocation11 + $0x78] sm:$0xff] (!%p1702_p9) }
 0x344   :  { %v772_v35 = vmul.f32 (!%p1702_p9), %v756_v7, %v2411_v6 }
 0x345   :  { %719 = vst.msk [vmem:[#allocation3 + $0x78] sm:$0xff] %vm99_vm0, %v702_v16  ;;  %710 = vst.msk [vmem:[#allocation3 + $0x30] sm:$0xff] %vm99_vm0, %v693_v58  ;;  %1926 = vmatpush3.bf16.xpose.msra.mxu0 (!%p1702_p9), %v1923_v9  ;;  %1970 = vmatpush3.bf16.xpose.msra.mxu1 (!%p1702_p9), %v1923_v9 }
 0x346   :  { %v684_v22 = vpop.xlane.xlu0 %683  ;;  %1928 = vmatprep.subr.bf16.mxu0 (!%p1702_p9), %v1927_v39  ;;  %1963 = vmatprep.subr.bf16.mxu1 (!%p1702_p9), %v1927_v39 }
 0x347   :  { %v701_v31 = vadd.f32 %v684_v22, %v525_v62 }
 0x349   :  { %718 = vst.msk [vmem:[#allocation3 + $0x70] sm:$0xff] %vm99_vm0, %v701_v31 }
 0x34d   :  { %1930 = vmatpush3.bf16.xpose.msra.mxu0 %v1927_v39  ;;  %1971 = vmatpush3.bf16.xpose.msra.mxu1 %v1927_v39 }
 0x34e   :  { %1932 = vmatprep.subr.bf16.mxu0 %v1931_v34  ;;  %1964 = vmatprep.subr.bf16.mxu1 %v1931_v34 }
 0x355   :  { %1934 = vmatpush3.bf16.xpose.msra.mxu0 %v1931_v34  ;;  %1972 = vmatpush3.bf16.xpose.msra.mxu1 %v1931_v34  ;;  %v2300_v34 = vmov 0  }
 0x356   :  { %1936 = vmatprep.subr.bf16.mxu0 %v1935_v54  ;;  %1965 = vmatprep.subr.bf16.mxu1 %v1935_v54 }
 0x357   :  { %2053 = vset.pattern.permute.xlu0 %v2300_v34  ;;  %2052 = vset.pattern.permute.xlu1 %v2300_v34  ;;  %v3075_v34 = vld [vmem:[#allocation4 + $0x30] sm:$0xff] }
 0x35d   :  { %1938 = vmatpush3.bf16.xpose.msra.mxu0 %v1935_v54  ;;  %1973 = vmatpush3.bf16.xpose.msra.mxu1 %v1935_v54 }
 0x35e   :  { %1940 = vmatprep.subr.bf16.mxu0 %v1939_v18  ;;  %1966 = vmatprep.subr.bf16.mxu1 %v1939_v18 }
 0x365   :  { %1942 = vmatpush3.bf16.xpose.msra.mxu0 %v1939_v18  ;;  %1974 = vmatpush3.bf16.xpose.msra.mxu1 %v1939_v18  ;;  %v2968_v18 = vld [vmem:[#allocation4 + $0x8] sm:$0xff] }
 0x36c   :  { %1856 = vmatmul.mubr.f32.vlgmr.msra.gmra.mrb[0].mxu0 %v758_v52  ;;  %1868 = vmatmul.mubr.f32.vlgmr.msra.gmra.mrb[0].mxu1 %v766_v37  ;;  %v2976_v52 = vld [vmem:[#allocation4] sm:$0xff]  ;;  %v2978_v37 = vld [vmem:[#allocation4 + $0x18] sm:$0xff] }
 0x36d   :  { %1858 = vmatprep.mubr.f32.mxu0 %v759_v56  ;;  %1870 = vmatprep.mubr.f32.mxu1 %v767_v26 }
 0x370   :  { %1859 = vmatmul.mubr.f32.gmra.mrb[2].mxu0 %v760_v49  ;;  %1871 = vmatmul.mubr.f32.gmra.mrb[2].mxu1 %v768_v20  ;;  %v2996_v49 = vld [vmem:[#allocation4 + $0x40] sm:$0xff]  ;;  %v2998_v20 = vld [vmem:[#allocation4 + $0x58] sm:$0xff] }
 0x371   :  { %1861 = vmatprep.mubr.f32.mxu0 %v761_v44  ;;  %1873 = vmatprep.mubr.f32.mxu1 %v769_v45 }
 0x374   :  { %1862 = vmatmul.mubr.f32.gmra.mrb[4].mxu0 %v762_v55  ;;  %1874 = vmatmul.mubr.f32.gmra.mrb[4].mxu1 %v770_v61  ;;  %v3015_v55 = vld [vmem:[#allocation4 + $0x50] sm:$0xff] }
 0x375   :  { %1864 = vmatprep.mubr.f32.mxu0 %v763_v28  ;;  %1876 = vmatprep.mubr.f32.mxu1 %v771_v46  ;;  %v3017_v61 = vld [vmem:[#allocation4 + $0x10] sm:$0xff] }
 0x378   :  { %1865 = vmatmul.mubr.f32.gmra.mrb[6].mxu0 %v764_v36  ;;  %1877 = vmatmul.mubr.f32.gmra.mrb[6].mxu1 %v772_v35 }
 0x43f   :  { %v1857_v30 = vpop.f32.mrb[0].mxu0  ;;  %v1869_v13 = vpop.f32.mrb[0].mxu1 }
 0x440   :  { %v855_v16 = vpop.f32.mrb[1].mxu0  ;;  %v2888_v62 = vsel %vm2513_vm1, %v1869_v13, -1e+30  ;;  %v2892_v22 = vsel %vm2513_vm1, %v1857_v30, -1e+30  ;;  %v895_v31 = vpop.f32.mrb[1].mxu1 }
 0x441   :  { %984 = vmax.xlane.f32.xlu1 %v2888_v62  ;;  %968 = vmax.xlane.f32.xlu0 %v2892_v22  ;;  %v2898_v24 = vsel %vm2513_vm1, %v855_v16, -1e+30  ;;  %v2912_v19 = vsel %vm2513_vm1, %v895_v31, -1e+30  ;;  %v3035_v30 = vld [vmem:[#allocation4 + $0x28] sm:$0xff]  ;;  %v3037_v13 = vld [vmem:[#allocation4 + $0x20] sm:$0xff] }
 0x443   :  { %v1860_v6 = vpop.f32.mrb[2].mxu0  ;;  %v1872_v29 = vpop.f32.mrb[2].mxu1 }
 0x444   :  { %v2902_v23 = vsel %vm2513_vm1, %v1860_v6, -1e+30  ;;  %v865_v63 = vpop.f32.mrb[3].mxu0  ;;  %v905_v32 = vpop.f32.mrb[3].mxu1  ;;  %v2908_v10 = vsel %vm2513_vm1, %v1872_v29, -1e+30 }
 0x445   :  { %966 = vmax.xlane.f32.xlu0 %v2898_v24  ;;  %972 = vmax.xlane.f32.xlu1 %v2902_v23  ;;  %v2918_v12 = vsel %vm2513_vm1, %v905_v32, -1e+30  ;;  %v2922_v57 = vsel %vm2513_vm1, %v865_v63, -1e+30  ;;  %v3054_v32 = vld [vmem:[#allocation4 + $0x68] sm:$0xff] }
 0x447   :  { %v1863_v14 = vpop.f32.mrb[4].mxu0  ;;  %v1875_v38 = vpop.f32.mrb[4].mxu1 }
 0x448   :  { %v875_v1 = vpop.f32.mrb[5].mxu0  ;;  %v915_v50 = vpop.f32.mrb[5].mxu1  ;;  %v2928_v2 = vsel %vm2513_vm1, %v1863_v14, -1e+30  ;;  %v2938_v47 = vsel %vm2513_vm1, %v1875_v38, -1e+30 }
 0x449   :  { %982 = vmax.xlane.f32.xlu0 %v2912_v19  ;;  %988 = vmax.xlane.f32.xlu1 %v2908_v10  ;;  %v2932_v39 = vsel %vm2513_vm1, %v875_v1, -1e+30  ;;  %v2942_v25 = vsel %vm2513_vm1, %v915_v50, -1e+30  ;;  %v3056_v14 = vld [vmem:[#allocation4 + $0x60] sm:$0xff] }
 0x44b   :  { %v1866_v27 = vpop.f32.mrb[6].mxu0  ;;  %v1878_v40 = vpop.f32.mrb[6].mxu1 }
 0x44c   :  { %v885_v9 = vpop.f32.mrb[7].mxu0  ;;  %v925_v48 = vpop.f32.mrb[7].mxu1  ;;  %v2948_v53 = vsel %vm2513_vm1, %v1866_v27, -1e+30  ;;  %v2958_v54 = vsel %vm2513_vm1, %v1878_v40, -1e+30 }
 0x44d   :  { %986 = vmax.xlane.f32.xlu0 %v2918_v12  ;;  %970 = vmax.xlane.f32.xlu1 %v2922_v57  ;;  %v2952_v15 = vsel %vm2513_vm1, %v885_v9, -1e+30  ;;  %v2962_v3 = vsel %vm2513_vm1, %v925_v48, -1e+30  ;;  %v3073_v48 = vld [vmem:[#allocation4 + $0x38] sm:$0xff] }
 0x451   :  { %976 = vmax.xlane.f32.xlu1 %v2928_v2  ;;  %974 = vmax.xlane.f32.xlu0 %v2932_v39 }
 0x455   :  { %992 = vmax.xlane.f32.xlu1 %v2938_v47  ;;  %990 = vmax.xlane.f32.xlu0 %v2942_v25 }
 0x459   :  { %980 = vmax.xlane.f32.xlu1 %v2948_v53  ;;  %978 = vmax.xlane.f32.xlu0 %v2952_v15 }
 0x45d   :  { %996 = vmax.xlane.f32.xlu1 %v2958_v54  ;;  %994 = vmax.xlane.f32.xlu0 %v2962_v3 }
 0x4ce   :  { %v985_v8 = vpop.xlane.xlu1 %984  ;;  %v969_v51 = vpop.xlane.xlu0 %968 }
 0x4cf   :  { %v2971_v60 = vmax.f32 %v2966_v5, %v985_v8  ;;  %v2974_v59 = vmax.f32 %v2968_v18, %v969_v51 }
 0x4d1   :  { %1295 = vst.msk [vmem:[#allocation4 + $0x48] sm:$0xff] %vm99_vm0, %v2971_v60  ;;  %v1031_v0 = vsub.f32 %v2968_v18, %v2974_v59  ;;  %1287 = vst.msk [vmem:[#allocation4 + $0x8] sm:$0xff] %vm99_vm0, %v2974_v59  ;;  %1101 = vperm.xlu1 %2052, %v2974_v59   ;;  %1141 = vperm.xlu0 %2053, %v2971_v60  }
 0x4d2   :  { %v967_v26 = vpop.xlane.xlu0 %966  ;;  %v973_v43 = vpop.xlane.xlu1 %972 }
 0x4d3   :  { %v2991_v4 = vmax.f32 %v2976_v52, %v967_v26  ;;  %v2994_v17 = vmax.f32 %v2978_v37, %v973_v43 }
 0x4d5   :  { %1286 = vst.msk [vmem:[#allocation4] sm:$0xff] %vm99_vm0, %v2991_v4  ;;  %1289 = vst.msk [vmem:[#allocation4 + $0x18] sm:$0xff] %vm99_vm0, %v2994_v17  ;;  %1096 = vperm.xlu0 %2053, %v2991_v4  }
 0x4d6   :  { %v983_v45 = vpop.xlane.xlu0 %982  ;;  %v989_v33 = vpop.xlane.xlu1 %988 }
 0x4d7   :  { %v3010_v41 = vmax.f32 %v2996_v49, %v983_v45  ;;  %v3013_v11 = vmax.f32 %v2998_v20, %v989_v33 }
 0x4d9   :  { %1294 = vst.msk [vmem:[#allocation4 + $0x40] sm:$0xff] %vm99_vm0, %v3010_v41  ;;  %1297 = vst.msk [vmem:[#allocation4 + $0x58] sm:$0xff] %vm99_vm0, %v3013_v11  ;;  %1136 = vperm.xlu1 %2052, %v3010_v41   ;;  %1151 = vperm.xlu0 %2053, %v3013_v11  }
 0x4da   :  { %v987_v46 = vpop.xlane.xlu0 %986  ;;  %v971_v7 = vpop.xlane.xlu1 %970 }
 0x4db   :  { %v3030_v36 = vmax.f32 %v3015_v55, %v987_v46  ;;  %v3033_v35 = vmax.f32 %v3017_v61, %v971_v7  ;;  %v3093_v46 = vld [vmem:[#allocation4 + $0x78] sm:$0xff]  ;;  %v3095_v7 = vld [vmem:[#allocation4 + $0x70] sm:$0xff] }
 0x4dd   :  { %1296 = vst.msk [vmem:[#allocation4 + $0x50] sm:$0xff] %vm99_vm0, %v3030_v36  ;;  %1288 = vst.msk [vmem:[#allocation4 + $0x10] sm:$0xff] %vm99_vm0, %v3033_v35  ;;  %1111 = vperm.xlu1 %2052, %v2994_v17  }
 0x4de   :  { %v977_v31 = vpop.xlane.xlu1 %976  ;;  %v975_v6 = vpop.xlane.xlu0 %974 }
 0x4df   :  { %v3049_v29 = vmax.f32 %v3035_v30, %v977_v31  ;;  %v3052_v63 = vmax.f32 %v3037_v13, %v975_v6 }
 0x4e1   :  { %1291 = vst.msk [vmem:[#allocation4 + $0x28] sm:$0xff] %vm99_vm0, %v3049_v29  ;;  %1106 = vperm.xlu1 %2052, %v3033_v35   ;;  %1290 = vst.msk [vmem:[#allocation4 + $0x20] sm:$0xff] %vm99_vm0, %v3052_v63 }
 0x4e2   :  { %v993_v50 = vpop.xlane.xlu1 %992  ;;  %v991_v27 = vpop.xlane.xlu0 %990 }
 0x4e3   :  { %v3068_v40 = vmax.f32 %v3054_v32, %v993_v50  ;;  %v3071_v9 = vmax.f32 %v3056_v14, %v991_v27 }
 0x4e5   :  { %1299 = vst.msk [vmem:[#allocation4 + $0x68] sm:$0xff] %vm99_vm0, %v3068_v40  ;;  %1146 = vperm.xlu1 %2052, %v3030_v36   ;;  %1161 = vperm.xlu0 %2053, %v3068_v40   ;;  %1298 = vst.msk [vmem:[#allocation4 + $0x60] sm:$0xff] %vm99_vm0, %v3071_v9 }
 0x4e6   :  { %v981_v26 = vpop.xlane.xlu1 %980  ;;  %v979_v43 = vpop.xlane.xlu0 %978 }
 0x4e7   :  { %v3088_v45 = vmax.f32 %v3073_v48, %v981_v26  ;;  %v3091_v33 = vmax.f32 %v3075_v34, %v979_v43 }
 0x4e9   :  { %1293 = vst.msk [vmem:[#allocation4 + $0x38] sm:$0xff] %vm99_vm0, %v3088_v45  ;;  %1121 = vperm.xlu1 %2052, %v3049_v29   ;;  %1292 = vst.msk [vmem:[#allocation4 + $0x30] sm:$0xff] %vm99_vm0, %v3091_v33 }
 0x4ea   :  { %v997_v50 = vpop.xlane.xlu1 %996  ;;  %v995_v27 = vpop.xlane.xlu0 %994 }
 0x4eb   :  { %v3107_v26 = vmax.f32 %v3093_v46, %v997_v50  ;;  %v3110_v43 = vmax.f32 %v3095_v7, %v995_v27 }
 0x4ed   :  { %1301 = vst.msk [vmem:[#allocation4 + $0x78] sm:$0xff] %vm99_vm0, %v3107_v26  ;;  %1116 = vperm.xlu1 %2052, %v3052_v63   ;;  %1171 = vperm.xlu0 %2053, %v3107_v26   ;;  %1300 = vst.msk [vmem:[#allocation4 + $0x70] sm:$0xff] %vm99_vm0, %v3110_v43 }
 0x4f1   :  { %1156 = vperm.xlu1 %2052, %v3071_v9  }
 0x4f5   :  { %1131 = vperm.xlu1 %2052, %v3088_v45  }
 0x4f9   :  { %1126 = vperm.xlu1 %2052, %v3091_v33  }
 0x4fd   :  { %1166 = vperm.xlu1 %2052, %v3110_v43  }
 0x550   :  { %v1102_v50 = vpop.permute.xlu1 %1101  ;;  %v1142_v27 = vpop.permute.xlu0 %1141 }
 0x551   :  { %v1175_v31 = vsub.f32 %v2892_v22, %v1102_v50  ;;  %v1183_v51 = vsub.f32 %v2888_v62, %v1142_v27 }
 0x553   :  { %v1192_v8 = vmul.f32 1.442695, %v1175_v31  ;;  %v1208_v1 = vmul.f32 1.442695, %v1183_v51 }
 0x554   :  { %v1097_v6 = vpop.permute.xlu0 %1096 }
 0x555   :  { %2054 = vpow2.f32 %v1192_v8  ;;  %v1174_v38 = vsub.f32 %v2898_v24, %v1097_v6 }
 0x556   :  { %2056 = vpow2.f32 %v1208_v1 }
 0x557   :  { %v1190_v16 = vmul.f32 1.442695, %v1174_v38 }
 0x558   :  { %v1137_v58 = vpop.permute.xlu1 %1136  ;;  %v1152_v42 = vpop.permute.xlu0 %1151 }
 0x559   :  { %2058 = vpow2.f32 %v1190_v16  ;;  %v1182_v21 = vsub.f32 %v2912_v19, %v1137_v58  ;;  %v1185_v44 = vsub.f32 %v2908_v10, %v1152_v42 }
 0x55b   :  { %v1206_v28 = vmul.f32 1.442695, %v1182_v21  ;;  %v1212_v8 = vmul.f32 1.442695, %v1185_v44 }
 0x55c   :  { %v1112_v56 = vpop.permute.xlu1 %1111 }
 0x55d   :  { %2060 = vpow2.f32 %v1206_v28  ;;  %v1177_v62 = vsub.f32 %v2902_v23, %v1112_v56 }
 0x55f   :  { %v2055_v22 = vpop.eup %2054  ;;  %v1196_v51 = vmul.f32 1.442695, %v1177_v62 }
 0x560   :  { %v2057_v31 = vpop.eup %2056  ;;  %v1107_v50 = vpop.permute.xlu1 %1106  ;;  %1224 = vadd.xlane.f32.xlu0 %v2055_v22 }
 0x561   :  { %2062 = vpow2.f32 %v1196_v51  ;;  %v1176_v24 = vsub.f32 %v2922_v57, %v1107_v50  ;;  %1240 = vadd.xlane.f32.xlu1 %v2057_v31 }
 0x562   :  { %2064 = vpow2.f32 %v1212_v8 }
 0x563   :  { %v2059_v16 = vpop.eup %2058  ;;  %v1194_v19 = vmul.f32 1.442695, %v1176_v24 }
 0x564   :  { %v1147_v21 = vpop.permute.xlu1 %1146  ;;  %v1162_v42 = vpop.permute.xlu0 %1161 }
 0x565   :  { %2066 = vpow2.f32 %v1194_v19  ;;  %v1184_v10 = vsub.f32 %v2918_v12, %v1147_v21  ;;  %1222 = vadd.xlane.f32.xlu1 %v2059_v16  ;;  %v1187_v28 = vsub.f32 %v2938_v47, %v1162_v42 }
 0x567   :  { %v2061_v23 = vpop.eup %2060  ;;  %v1210_v56 = vmul.f32 1.442695, %v1184_v10  ;;  %v1216_v1 = vmul.f32 1.442695, %v1187_v28 }
 0x568   :  { %v1122_v44 = vpop.permute.xlu1 %1121  ;;  %1238 = vadd.xlane.f32.xlu0 %v2061_v23 }
 0x569   :  { %2068 = vpow2.f32 %v1210_v56  ;;  %v1179_v58 = vsub.f32 %v2928_v2, %v1122_v44 }
 0x56b   :  { %v2063_v57 = vpop.eup %2062  ;;  %v1200_v38 = vmul.f32 1.442695, %v1179_v58 }
 0x56c   :  { %v1117_v6 = vpop.permute.xlu1 %1116  ;;  %1228 = vadd.xlane.f32.xlu1 %v2063_v57  ;;  %v2065_v12 = vpop.eup %2064 }
 0x56d   :  { %2070 = vpow2.f32 %v1200_v38  ;;  %v1178_v27 = vsub.f32 %v2932_v39, %v1117_v6  ;;  %v1172_v47 = vpop.permute.xlu0 %1171  ;;  %v3612_v6 = vsub.f32 %v2966_v5, %v2971_v60  ;;  %v3616_v60 = vsub.f32 %v2998_v20, %v3013_v11 }
 0x56e   :  { %2072 = vpow2.f32 %v1216_v1  ;;  %v1189_v50 = vsub.f32 %v2958_v54, %v1172_v47  ;;  %v1048_v1 = vmul.f32 1.442695, %v1031_v0  ;;  %v1015_v0 = vld [vmem:[#allocation5 + $0x8] sm:$0xff] }
 0x56f   :  { %v2067_v62 = vpop.eup %2066  ;;  %v1198_v22 = vmul.f32 1.442695, %v1178_v27  ;;  %v3613_v27 = vsub.f32 %v2976_v52, %v2991_v4  ;;  %v1068_v47 = vmul.f32 1.442695, %v3616_v60  ;;  %v3617_v52 = vsub.f32 %v3017_v61, %v3033_v35  ;;  %v1022_v35 = vld [vmem:[#allocation5 + $0x40] sm:$0xff] }
 0x570   :  { %v1157_v51 = vpop.permute.xlu1 %1156  ;;  %1226 = vadd.xlane.f32.xlu0 %v2067_v62  ;;  %1244 = vadd.xlane.f32.xlu1 %v2065_v12  ;;  %v1220_v21 = vmul.f32 1.442695, %v1189_v50  ;;  %v3614_v62 = vsub.f32 %v2996_v49, %v3010_v41  ;;  %v1014_v50 = vld [vmem:[#allocation5] sm:$0xff] }
 0x571   :  { %2074 = vpow2.f32 %v1198_v22  ;;  %v1186_v31 = vsub.f32 %v2942_v25, %v1157_v51  ;;  %v1046_v12 = vmul.f32 1.442695, %v3613_v27  ;;  %v3615_v51 = vsub.f32 %v2978_v37, %v2994_v17  ;;  %v1024_v27 = vld [vmem:[#allocation5 + $0x50] sm:$0xff] }
 0x572   :  { %v1062_v22 = vmul.f32 1.442695, %v3614_v62  ;;  %v1050_v4 = vmul.f32 1.442695, %v3617_v52 }
 0x573   :  { %v2069_v2 = vpop.eup %2068  ;;  %v1214_v8 = vmul.f32 1.442695, %v1186_v31  ;;  %v1052_v18 = vmul.f32 1.442695, %v3615_v51  ;;  %v1023_v31 = vld [vmem:[#allocation5 + $0x48] sm:$0xff] }
 0x574   :  { %v1132_v24 = vpop.permute.xlu1 %1131  ;;  %1242 = vadd.xlane.f32.xlu0 %v2069_v2 }
 0x575   :  { %2076 = vpow2.f32 %v1214_v8  ;;  %v1181_v39 = vsub.f32 %v2948_v53, %v1132_v24  ;;  %v3618_v24 = vsub.f32 %v3015_v55, %v3030_v36  ;;  %v1017_v36 = vld [vmem:[#allocation5 + $0x18] sm:$0xff] }
 0x577   :  { %v2071_v16 = vpop.eup %2070  ;;  %v1204_v19 = vmul.f32 1.442695, %v1181_v39  ;;  %v1066_v39 = vmul.f32 1.442695, %v3618_v24 }
 0x578   :  { %v1127_v10 = vpop.permute.xlu1 %1126  ;;  %1232 = vadd.xlane.f32.xlu1 %v2071_v16  ;;  %v2073_v23 = vpop.eup %2072 }
 0x579   :  { %2078 = vpow2.f32 %v1204_v19  ;;  %v1180_v42 = vsub.f32 %v2952_v15, %v1127_v10  ;;  %v3619_v19 = vsub.f32 %v3035_v30, %v3049_v29 }
 0x57a   :  { %2080 = vpow2.f32 %v1220_v21 }
 0x57b   :  { %v2075_v56 = vpop.eup %2074  ;;  %v1202_v25 = vmul.f32 1.442695, %v1180_v42  ;;  %v1056_v21 = vmul.f32 1.442695, %v3619_v19 }
 0x57c   :  { %1230 = vadd.xlane.f32.xlu0 %v2075_v56  ;;  %v1167_v28 = vpop.permute.xlu1 %1166  ;;  %1248 = vadd.xlane.f32.xlu1 %v2073_v23  ;;  %v3620_v56 = vsub.f32 %v3037_v13, %v3052_v63  ;;  %v3622_v13 = vsub.f32 %v3056_v14, %v3071_v9 }
 0x57d   :  { %2082 = vpow2.f32 %v1202_v25  ;;  %v1188_v54 = vsub.f32 %v2962_v3, %v1167_v28  ;;  %v1064_v3 = vmul.f32 1.442695, %v3612_v6 }
 0x57e   :  { %v1054_v25 = vmul.f32 1.442695, %v3620_v56  ;;  %v1070_v63 = vmul.f32 1.442695, %v3622_v13 }
 0x57f   :  { %v2077_v44 = vpop.eup %2076  ;;  %v1218_v53 = vmul.f32 1.442695, %v1188_v54  ;;  %v3621_v54 = vsub.f32 %v3054_v32, %v3068_v40 }
 0x580   :  { %1246 = vadd.xlane.f32.xlu0 %v2077_v44 }
 0x581   :  { %2084 = vpow2.f32 %v1218_v53  ;;  %v1072_v44 = vmul.f32 1.442695, %v3621_v54  ;;  %v1028_v54 = vld [vmem:[#allocation5 + $0x70] sm:$0xff] }
 0x582   :  { %2086 = vpow2.f32 %v1048_v1 }
 0x583   :  { %v2079_v58 = vpop.eup %2078  ;;  %2088 = vpow2.f32 %v1064_v3 }
 0x584   :  { %1236 = vadd.xlane.f32.xlu1 %v2079_v58  ;;  %v2081_v57 = vpop.eup %2080  ;;  %2090 = vpow2.f32 %v1046_v12 }
 0x585   :  { %2092 = vpow2.f32 %v1062_v22  ;;  %v3623_v22 = vsub.f32 %v3073_v48, %v3088_v45 }
 0x586   :  { %2094 = vpow2.f32 %v1052_v18 }
 0x587   :  { %v2083_v38 = vpop.eup %2082  ;;  %2096 = vpow2.f32 %v1068_v47  ;;  %v1060_v51 = vmul.f32 1.442695, %v3623_v22  ;;  %v3625_v47 = vsub.f32 %v3093_v46, %v3107_v26 }
 0x588   :  { %1234 = vadd.xlane.f32.xlu0 %v2083_v38  ;;  %1252 = vadd.xlane.f32.xlu1 %v2081_v57  ;;  %2098 = vpow2.f32 %v1050_v4  ;;  %v1025_v57 = vld [vmem:[#allocation5 + $0x58] sm:$0xff]  ;;  %v1016_v38 = vld [vmem:[#allocation5 + $0x10] sm:$0xff] }
 0x589   :  { %2100 = vpow2.f32 %v1066_v39  ;;  %v1076_v48 = vmul.f32 1.442695, %v3625_v47 }
 0x58a   :  { %2102 = vpow2.f32 %v1056_v21 }
 0x58b   :  { %v2085_v15 = vpop.eup %2084  ;;  %2104 = vpow2.f32 %v1054_v25 }
 0x58c   :  { %1250 = vadd.xlane.f32.xlu0 %v2085_v15  ;;  %v2087_v59 = vpop.eup %2086  ;;  %2106 = vpow2.f32 %v1072_v44 }
 0x58d   :  { %v2089_v5 = vpop.eup %2088  ;;  %v1079_v49 = vmul.f32 %v2087_v59, %v1015_v0  ;;  %2108 = vpow2.f32 %v1070_v63  ;;  %v1019_v59 = vld [vmem:[#allocation5 + $0x28] sm:$0xff]  ;;  %v3624_v0 = vsub.f32 %v3075_v34, %v3091_v33  ;;  %v3626_v34 = vsub.f32 %v3095_v7, %v3110_v43  ;;  %v1021_v7 = vld [vmem:[#allocation5 + $0x38] sm:$0xff] }
 0x58e   :  { %v1087_v41 = vmul.f32 %v2089_v5, %v1023_v31  ;;  %v2091_v8 = vpop.eup %2090  ;;  %2110 = vpow2.f32 %v1060_v51 }
 0x58f   :  { %v2093_v11 = vpop.eup %2092  ;;  %v1078_v61 = vmul.f32 %v2091_v8, %v1014_v50  ;;  %v1058_v5 = vmul.f32 1.442695, %v3624_v0  ;;  %v1074_v33 = vmul.f32 1.442695, %v3626_v34  ;;  %v1026_v50 = vld [vmem:[#allocation5 + $0x60] sm:$0xff] }
 0x590   :  { %v1086_v42 = vmul.f32 %v2093_v11, %v1022_v35  ;;  %v2095_v23 = vpop.eup %2094 }
 0x591   :  { %v2097_v53 = vpop.eup %2096  ;;  %v1081_v30 = vmul.f32 %v2095_v23, %v1017_v36  ;;  %2112 = vpow2.f32 %v1058_v5 }
 0x592   :  { %v2099_v29 = vpop.eup %2098  ;;  %v1089_v1 = vmul.f32 %v2097_v53, %v1025_v57  ;;  %2114 = vpow2.f32 %v1076_v48 }
 0x593   :  { %v1080_v32 = vmul.f32 %v2099_v29, %v1016_v38  ;;  %v2101_v40 = vpop.eup %2100  ;;  %2116 = vpow2.f32 %v1074_v33 }
 0x594   :  { %v1088_v14 = vmul.f32 %v2101_v40, %v1024_v27  ;;  %v2103_v9 = vpop.eup %2102 }
 0x595   :  { %v2105_v45 = vpop.eup %2104  ;;  %v1083_v31 = vmul.f32 %v2103_v9, %v1019_v59 }
 0x596   :  { %v2107_v52 = vpop.eup %2106 }
 0x597   :  { %v2109_v26 = vpop.eup %2108 }
 0x598   :  { %v2111_v11 = vpop.eup %2110 }
 0x59b   :  { %v2113_v35 = vpop.eup %2112 }
 0x59c   :  { %v2115_v19 = vpop.eup %2114 }
 0x59d   :  { %v2117_v56 = vpop.eup %2116 }
 0x5ed   :  { %v1225_v2 = vpop.xlane.xlu0 %1224 }
 0x5ee   :  { %v1241_v37 = vpop.xlane.xlu1 %1240  ;;  %v1255_v17 = vadd.f32 %v1225_v2, %v1079_v49  ;;  %v1027_v49 = vld [vmem:[#allocation5 + $0x68] sm:$0xff] }
 0x5ef   :  { %v1263_v20 = vadd.f32 %v1241_v37, %v1087_v41  ;;  %v1018_v41 = vld [vmem:[#allocation5 + $0x20] sm:$0xff]  ;;  %v1091_v8 = vmul.f32 %v2107_v52, %v1027_v49 }
 0x5f0   :  { %1271 = vst.msk [vmem:[#allocation5 + $0x8] sm:$0xff] %vm99_vm0, %v1255_v17  ;;  %v1082_v46 = vmul.f32 %v2105_v45, %v1018_v41 }
 0x5f1   :  { %1279 = vst.msk [vmem:[#allocation5 + $0x48] sm:$0xff] %vm99_vm0, %v1263_v20  ;;  %v1090_v20 = vmul.f32 %v2109_v26, %v1026_v50 }
 0x5f2   :  { %v1223_v16 = vpop.xlane.xlu1 %1222 }
 0x5f3   :  { %v1254_v10 = vadd.f32 %v1223_v16, %v1078_v61  ;;  %v1085_v16 = vmul.f32 %v2111_v11, %v1021_v7 }
 0x5f5   :  { %1270 = vst.msk [vmem:[#allocation5] sm:$0xff] %vm99_vm0, %v1254_v10  ;;  %v1239_v55 = vpop.xlane.xlu0 %1238  ;;  %v1029_v10 = vld [vmem:[#allocation5 + $0x78] sm:$0xff] }
 0x5f6   :  { %v1262_v28 = vadd.f32 %v1239_v55, %v1086_v42  ;;  %v1020_v42 = vld [vmem:[#allocation5 + $0x30] sm:$0xff]  ;;  %v1093_v55 = vmul.f32 %v2115_v19, %v1029_v10 }
 0x5f7   :  { %v1084_v36 = vmul.f32 %v2113_v35, %v1020_v42 }
 0x5f8   :  { %1278 = vst.msk [vmem:[#allocation5 + $0x40] sm:$0xff] %vm99_vm0, %v1262_v28 }
 0x5f9   :  { %v1229_v58 = vpop.xlane.xlu1 %1228 }
 0x5fa   :  { %v1257_v15 = vadd.f32 %v1229_v58, %v1081_v30  ;;  %v1092_v30 = vmul.f32 %v2117_v56, %v1028_v54 }
 0x5fc   :  { %1273 = vst.msk [vmem:[#allocation5 + $0x18] sm:$0xff] %vm99_vm0, %v1257_v15 }
 0x5fd   :  { %v1245_v6 = vpop.xlane.xlu1 %1244  ;;  %v1227_v3 = vpop.xlane.xlu0 %1226 }
 0x5fe   :  { %v1265_v12 = vadd.f32 %v1245_v6, %v1089_v1  ;;  %v1256_v62 = vadd.f32 %v1227_v3, %v1080_v32 }
 0x600   :  { %1281 = vst.msk [vmem:[#allocation5 + $0x58] sm:$0xff] %vm99_vm0, %v1265_v12  ;;  %1272 = vst.msk [vmem:[#allocation5 + $0x10] sm:$0xff] %vm99_vm0, %v1256_v62 }
 0x601   :  { %v1243_v18 = vpop.xlane.xlu0 %1242 }
 0x602   :  { %v1264_v60 = vadd.f32 %v1243_v18, %v1088_v14 }
 0x604   :  { %1280 = vst.msk [vmem:[#allocation5 + $0x50] sm:$0xff] %vm99_vm0, %v1264_v60 }
 0x605   :  { %v1233_v4 = vpop.xlane.xlu1 %1232 }
 0x606   :  { %v1259_v2 = vadd.f32 %v1233_v4, %v1083_v31 }
 0x608   :  { %1275 = vst.msk [vmem:[#allocation5 + $0x28] sm:$0xff] %vm99_vm0, %v1259_v2 }
 0x609   :  { %v1249_v37 = vpop.xlane.xlu1 %1248  ;;  %v1231_v17 = vpop.xlane.xlu0 %1230 }
 0x60a   :  { %v1267_v24 = vadd.f32 %v1249_v37, %v1091_v8  ;;  %v1258_v39 = vadd.f32 %v1231_v17, %v1082_v46 }
 0x60c   :  { %1283 = vst.msk [vmem:[#allocation5 + $0x68] sm:$0xff] %vm99_vm0, %v1267_v24  ;;  %1274 = vst.msk [vmem:[#allocation5 + $0x20] sm:$0xff] %vm99_vm0, %v1258_v39 }
 0x60d   :  { %v1247_v61 = vpop.xlane.xlu0 %1246 }
 0x60e   :  { %v1266_v43 = vadd.f32 %v1247_v61, %v1090_v20 }
 0x610   :  { %1282 = vst.msk [vmem:[#allocation5 + $0x60] sm:$0xff] %vm99_vm0, %v1266_v43 }
 0x611   :  { %v1237_v21 = vpop.xlane.xlu1 %1236 }
 0x612   :  { %v1261_v23 = vadd.f32 %v1237_v21, %v1085_v16 }
 0x614   :  { %1277 = vst.msk [vmem:[#allocation5 + $0x38] sm:$0xff] %vm99_vm0, %v1261_v23 }
 0x615   :  { %v1253_v25 = vpop.xlane.xlu1 %1252  ;;  %v1235_v28 = vpop.xlane.xlu0 %1234 }
 0x616   :  { %v1269_v44 = vadd.f32 %v1253_v25, %v1093_v55  ;;  %v1260_v53 = vadd.f32 %v1235_v28, %v1084_v36 }
 0x618   :  { %1285 = vst.msk [vmem:[#allocation5 + $0x78] sm:$0xff] %vm99_vm0, %v1269_v44  ;;  %1276 = vst.msk [vmem:[#allocation5 + $0x30] sm:$0xff] %vm99_vm0, %v1260_v53 }
 0x619   :  { %v1251_v29 = vpop.xlane.xlu0 %1250 }
 0x61a   :  { %v1268_v58 = vadd.f32 %v1251_v29, %v1092_v30 }
 0x61c   :  { %1284 = vst.msk [vmem:[#allocation5 + $0x70] sm:$0xff] %vm99_vm0, %v1268_v58 }
 0x61d PF:  { %v1467_v57 = vld [vmem:[#allocation11 + $0x10] sm:$0xff]  ;;  %v1465_v38 = vld [vmem:[#allocation11] sm:$0xff]  ;;  %v1468_v15 = vld [vmem:[#allocation11 + $0x18] sm:$0xff] }
 0x61e   :  { %v3627_v13 = vld [vmem:[#allocation24_spill] sm:$0xff]  ;;  %v1466_v40 = vld [vmem:[#allocation11 + $0x8] sm:$0xff]  ;;  %v3629_v6 = vld [vmem:[#allocation26_spill] sm:$0xff] }
 0x61f   :  { %v1483_v63 = vmul.f32 %v1467_v57, %v3627_v13  ;;  %v3628_v1 = vld [vmem:[#allocation20_spill] sm:$0xff]  ;;  %v1484_v3 = vmul.f32 %v1468_v15, %v3629_v6  ;;  %v3630_v27 = vld [vmem:[#allocation22_spill] sm:$0xff]  ;;  %v1470_v62 = vld [vmem:[#allocation11 + $0x28] sm:$0xff] }
 0x620   :  { %v1481_v32 = vmul.f32 %v1465_v38, %v3628_v1  ;;  %v1482_v12 = vmul.f32 %v1466_v40, %v3630_v27  ;;  %v1469_v22 = vld [vmem:[#allocation11 + $0x20] sm:$0xff]  ;;  %v3631_v51 = vld [vmem:[#allocation30_spill] sm:$0xff]  ;;  %v1472_v59 = vld [vmem:[#allocation11 + $0x38] sm:$0xff] }
 0x621   :  { %1501 = vadd.xlane.f32.xlu1 %v1483_v63  ;;  %v1486_v14 = vmul.f32 %v1470_v62, %v3631_v51  ;;  %v3632_v9 = vld [vmem:[#allocation28_spill] sm:$0xff]  ;;  %v1471_v0 = vld [vmem:[#allocation11 + $0x30] sm:$0xff]  ;;  %v1474_v45 = vld [vmem:[#allocation11 + $0x48] sm:$0xff] }
 0x622   :  { %1497 = vadd.xlane.f32.xlu0 %v1481_v32  ;;  %v1485_v18 = vmul.f32 %v1469_v22, %v3632_v9  ;;  %v3633_v5 = vld [vmem:[#allocation34_spill] sm:$0xff]  ;;  %v3634_v47 = vld [vmem:[#allocation32_spill] sm:$0xff]  ;;  %v3635_v52 = vld [vmem:[#allocation23_spill] sm:$0xff] }
 0x623   :  { %v1488_v60 = vmul.f32 %v1472_v59, %v3633_v5  ;;  %v1487_v48 = vmul.f32 %v1471_v0, %v3634_v47  ;;  %v1473_v31 = vld [vmem:[#allocation11 + $0x40] sm:$0xff]  ;;  %v1490_v4 = vmul.f32 %v1474_v45, %v3635_v52  ;;  %v3636_v49 = vld [vmem:[#allocation21_spill] sm:$0xff]  ;;  %v1476_v2 = vld [vmem:[#allocation11 + $0x58] sm:$0xff] }
 0x624   :  { %v1489_v41 = vmul.f32 %v1473_v31, %v3636_v49  ;;  %v1475_v34 = vld [vmem:[#allocation11 + $0x50] sm:$0xff]  ;;  %v3637_v33 = vld [vmem:[#allocation27_spill] sm:$0xff]  ;;  %v3638_v46 = vld [vmem:[#allocation25_spill] sm:$0xff] }
 0x625   :  { %1503 = vadd.xlane.f32.xlu1 %v1484_v3  ;;  %v1492_v8 = vmul.f32 %v1476_v2, %v3637_v33  ;;  %v1491_v26 = vmul.f32 %v1475_v34, %v3638_v46  ;;  %v1478_v37 = vld [vmem:[#allocation11 + $0x68] sm:$0xff]  ;;  %v1477_v17 = vld [vmem:[#allocation11 + $0x60] sm:$0xff]  ;;  %v3639_v50 = vld [vmem:[#allocation31_spill] sm:$0xff]  ;;  %v3643_v3 = vlaneseq }
 0x626   :  { %1499 = vadd.xlane.f32.xlu0 %v1482_v12  ;;  %v1494_v24 = vmul.f32 %v1478_v37, %v3639_v50  ;;  %v3640_v39 = vld [vmem:[#allocation29_spill] sm:$0xff]  ;;  %v1480_v11 = vld [vmem:[#allocation11 + $0x78] sm:$0xff]  ;;  %v1479_v61 = vld [vmem:[#allocation11 + $0x70] sm:$0xff] }
 0x627   :  { %v1493_v20 = vmul.f32 %v1477_v17, %v3640_v39  ;;  %v3641_v7 = vld [vmem:[#allocation35_spill] sm:$0xff]  ;;  %v3642_v35 = vld [vmem:[#allocation33_spill] sm:$0xff]  ;;  %v1323_v19 = vld [vmem:[#allocation3 + $0x10] sm:$0xff]  ;;  %v3223_v27 = vshrl.u32 %v3643_v3, 7 }
 0x628   :  { %v1496_v43 = vmul.f32 %v1480_v11, %v3641_v7  ;;  %v1495_v16 = vmul.f32 %v1479_v61, %v3642_v35  ;;  %v1403_v21 = vld [vmem:[#allocation5 + $0x10] sm:$0xff]  ;;  %v1321_v10 = vld [vmem:[#allocation3] sm:$0xff]  ;;  %2118 = vlog2.f32 %v1323_v19  ;;  %v1324_v23 = vld [vmem:[#allocation3 + $0x18] sm:$0xff] }
 0x629   :  { %1507 = vadd.xlane.f32.xlu1 %v1486_v14  ;;  %v1401_v42 = vld [vmem:[#allocation5] sm:$0xff]  ;;  %2120 = vlog2.f32 %v1403_v21  ;;  %v1404_v55 = vld [vmem:[#allocation5 + $0x18] sm:$0xff]  ;;  %v1322_v36 = vld [vmem:[#allocation3 + $0x8] sm:$0xff]  ;;  %v3229_v49 = vadd.s32 16, %v3223_v27  ;;  %v3238_v37 = vadd.s32 24, %v3223_v27  ;;  %v3241_v17 = vadd.s32 8, %v3223_v27 }
 0x62a   :  { %1505 = vadd.xlane.f32.xlu0 %v1485_v18  ;;  %2122 = vlog2.f32 %v1321_v10  ;;  %v1402_v56 = vld [vmem:[#allocation5 + $0x8] sm:$0xff]  ;;  %v1325_v54 = vld [vmem:[#allocation3 + $0x20] sm:$0xff]  ;;  %v1328_v53 = vld [vmem:[#allocation3 + $0x38] sm:$0xff] }
 0x62b   :  { %2124 = vlog2.f32 %v1401_v42  ;;  %v1326_v25 = vld [vmem:[#allocation3 + $0x28] sm:$0xff]  ;;  %v1405_v44 = vld [vmem:[#allocation5 + $0x20] sm:$0xff]  ;;  %v1408_v29 = vld [vmem:[#allocation5 + $0x38] sm:$0xff] }
 0x62c   :  { %2126 = vlog2.f32 %v1324_v23  ;;  %v1406_v28 = vld [vmem:[#allocation5 + $0x28] sm:$0xff]  ;;  %v1327_v38 = vld [vmem:[#allocation3 + $0x30] sm:$0xff]  ;;  %v1305_v0 = vld [vmem:[#allocation2] sm:$0xff] }
 0x62d   :  { %1511 = vadd.xlane.f32.xlu1 %v1488_v60  ;;  %2128 = vlog2.f32 %v1404_v55  ;;  %v1407_v13 = vld [vmem:[#allocation5 + $0x30] sm:$0xff]  ;;  %v1330_v32 = vld [vmem:[#allocation3 + $0x48] sm:$0xff]  ;;  %v1329_v60 = vld [vmem:[#allocation3 + $0x40] sm:$0xff] }
 0x62e   :  { %1509 = vadd.xlane.f32.xlu0 %v1487_v48  ;;  %2130 = vlog2.f32 %v1322_v36  ;;  %v1307_v51 = vld [vmem:[#allocation2 + $0x10] sm:$0xff]  ;;  %v1410_v18 = vld [vmem:[#allocation5 + $0x48] sm:$0xff]  ;;  %v3226_v48 = vstv %s2406_s25  ;;  %v1385_v45 = vld [vmem:[#allocation4] sm:$0xff] }
 0x62f   :  { %2132 = vlog2.f32 %v1402_v56  ;;  %v1387_v14 = vld [vmem:[#allocation4 + $0x10] sm:$0xff]  ;;  %v1308_v34 = vld [vmem:[#allocation2 + $0x18] sm:$0xff]  ;;  %v1306_v50 = vld [vmem:[#allocation2 + $0x8] sm:$0xff]  ;;  %vm1614_vm3 = vcmp.lt.s32.totalorder %v3229_v49, %v3226_v48  ;;  %vm1612_vm5 = vcmp.lt.s32.totalorder %v3223_v27, %v3226_v48  ;;  %vm1615_vm7 = vcmp.lt.s32.totalorder %v3238_v37, %v3226_v48 }
 0x630   :  { %2134 = vlog2.f32 %v1326_v25  ;;  %v1388_v33 = vld [vmem:[#allocation4 + $0x18] sm:$0xff]  ;;  %v1331_v11 = vld [vmem:[#allocation3 + $0x50] sm:$0xff]  ;;  %v1310_v10 = vld [vmem:[#allocation2 + $0x28] sm:$0xff]  ;;  %v3258_v25 = vadd.s32 40, %v3223_v27  ;;  %vm1613_vm9 = vcmp.lt.s32.totalorder %v3241_v17, %v3226_v48 }
 0x631   :  { %1515 = vadd.xlane.f32.xlu1 %v1490_v4  ;;  %2136 = vlog2.f32 %v1406_v28  ;;  %v1332_v39 = vld [vmem:[#allocation3 + $0x58] sm:$0xff]  ;;  %v1390_v42 = vld [vmem:[#allocation4 + $0x28] sm:$0xff]  ;;  %v1309_v55 = vld [vmem:[#allocation2 + $0x20] sm:$0xff]  ;;  %v3261_v28 = vadd.s32 32, %v3223_v27 }
 0x632   :  { %1513 = vadd.xlane.f32.xlu0 %v1489_v41  ;;  %v2119_v30 = vpop.eup %2118  ;;  %2138 = vlog2.f32 %v1325_v54  ;;  %v3644_v56 = vld [vmem:[#allocation36_spill] sm:$0xff]  ;;  %vm1617_vm11 = vcmp.lt.s32.totalorder %v3258_v25, %v3226_v48 }
 0x633   :  { %v2121_v58 = vpop.eup %2120  ;;  %2140 = vlog2.f32 %v1405_v44  ;;  %v1342_v12 = vmul.f32 0.6931472, %v2119_v30  ;;  %vm1565_vm2 = vcmp.lt.s32.totalorder %v3229_v49, %v3644_v56  ;;  %vm1563_vm4 = vcmp.lt.s32.totalorder %v3223_v27, %v3644_v56  ;;  %v1389_v44 = vld [vmem:[#allocation4 + $0x20] sm:$0xff]  ;;  %v1334_v30 = vld [vmem:[#allocation3 + $0x68] sm:$0xff] }
 0x634   :  { %v2123_v57 = vpop.eup %2122  ;;  %2142 = vlog2.f32 %v1328_v53  ;;  %v1422_v62 = vmul.f32 0.6931472, %v2121_v58  ;;  %v1411_v53 = vld [vmem:[#allocation5 + $0x50] sm:$0xff]  ;;  %vm1566_vm6 = vcmp.lt.s32.totalorder %v3238_v37, %v3644_v56  ;;  %vm1564_vm8 = vcmp.lt.s32.totalorder %v3241_v17, %v3644_v56 }
 0x635   :  { %1519 = vadd.xlane.f32.xlu1 %v1492_v8  ;;  %v2125_v15 = vpop.eup %2124  ;;  %2144 = vlog2.f32 %v1408_v29  ;;  %v1338_v9 = vmul.f32 0.6931472, %v2123_v57  ;;  %v3231_v41 = vadd.f32 %v1342_v12, %v1307_v51  ;;  %v1409_v8 = vld [vmem:[#allocation5 + $0x40] sm:$0xff]  ;;  %v3272_v12 = vadd.s32 56, %v3223_v27 }
 0x636   :  { %1517 = vadd.xlane.f32.xlu0 %v1491_v26  ;;  %v2127_v63 = vpop.eup %2126  ;;  %2146 = vlog2.f32 %v1327_v38  ;;  %v1418_v5 = vmul.f32 0.6931472, %v2125_v15  ;;  %v3233_v2 = vadd.f32 %v1422_v62, %v1387_v14  ;;  %v3285_v14 = vadd.s32 48, %v3223_v27 }
 0x637   :  { %v2129_v1 = vpop.eup %2128  ;;  %2148 = vlog2.f32 %v1407_v13  ;;  %v1344_v31 = vmul.f32 0.6931472, %v2127_v63  ;;  %v3235_v26 = vadd.f32 %v1338_v9, %v1305_v0  ;;  %v1311_v9 = vld [vmem:[#allocation2 + $0x30] sm:$0xff]  ;;  %vm1568_vm10 = vcmp.lt.s32.totalorder %v3258_v25, %v3644_v56 }
 0x638   :  { %v2131_v40 = vpop.eup %2130  ;;  %2150 = vlog2.f32 %v1330_v32  ;;  %v1424_v52 = vmul.f32 0.6931472, %v2129_v1  ;;  %v3243_v7 = vadd.f32 %v1418_v5, %v1385_v45  ;;  %v1312_v1 = vld [vmem:[#allocation2 + $0x38] sm:$0xff]  ;;  %vm1567_vm12 = vcmp.lt.s32.totalorder %v3261_v28, %v3644_v56 }
 0x639   :  { %1523 = vadd.xlane.f32.xlu1 %v1494_v24  ;;  %v2133_v6 = vpop.eup %2132  ;;  %2152 = vlog2.f32 %v1410_v18  ;;  %v1386_v24 = vld [vmem:[#allocation4 + $0x8] sm:$0xff]  ;;  %v3245_v19 = vadd.f32 %v1344_v31, %v1308_v34  ;;  %v1392_v32 = vld [vmem:[#allocation4 + $0x38] sm:$0xff]  ;;  %v3297_v34 = vadd.s32 64, %v3223_v27  ;;  %vm1616_vm13 = vcmp.lt.s32.totalorder %v3261_v28, %v3226_v48 }
 0x63a   :  { %1521 = vadd.xlane.f32.xlu0 %v1493_v20  ;;  %v2135_v22 = vpop.eup %2134  ;;  %2154 = vlog2.f32 %v1329_v60  ;;  %v1412_v20 = vld [vmem:[#allocation5 + $0x58] sm:$0xff]  ;;  %v1420_v35 = vmul.f32 0.6931472, %v2133_v6  ;;  %v3247_v21 = vadd.f32 %v1424_v52, %v1388_v33  ;;  %v3294_v52 = vadd.s32 72, %v3223_v27 }
 0x63b   :  { %v2137_v59 = vpop.eup %2136  ;;  %2156 = vlog2.f32 %v1409_v8  ;;  %v1336_v45 = vld [vmem:[#allocation3 + $0x78] sm:$0xff]  ;;  %vm1570_vm14 = vcmp.lt.s32.totalorder %v3272_v12, %v3644_v56  ;;  %vm1619_vm15 = vcmp.lt.s32.totalorder %v3272_v12, %v3226_v48  ;;  %vm1569_vm1 = vcmp.lt.s32.totalorder %v3285_v14, %v3644_v56 }
 0x63c   :  { %v2139_v47 = vpop.eup %2138  ;;  %v1428_v23 = vmul.f32 0.6931472, %v2137_v59  ;;  %2158 = vlog2.f32 %v1332_v39  ;;  %v3265_v13 = vadd.f32 %v1420_v35, %v1386_v24  ;;  %v1413_v59 = vld [vmem:[#allocation5 + $0x60] sm:$0xff]  ;;  %v3305_v24 = vadd.s32 80, %v3223_v27  ;;  %v1416_v39 = vld [vmem:[#allocation5 + $0x78] sm:$0xff] }
 0x63d   :  { %1527 = vadd.xlane.f32.xlu1 %v1496_v43  ;;  %v2141_v4 = vpop.eup %2140  ;;  %v1340_v43 = vmul.f32 0.6931472, %v2131_v40  ;;  %v1346_v54 = vmul.f32 0.6931472, %v2139_v47  ;;  %2160 = vlog2.f32 %v1412_v20  ;;  %v1414_v40 = vld [vmem:[#allocation5 + $0x68] sm:$0xff]  ;;  %v1391_v47 = vld [vmem:[#allocation4 + $0x30] sm:$0xff] }
 0x63e   :  { %1525 = vadd.xlane.f32.xlu0 %v1495_v16  ;;  %v2143_v46 = vpop.eup %2142  ;;  %v1348_v16 = vmul.f32 0.6931472, %v2135_v22  ;;  %v1426_v58 = vmul.f32 0.6931472, %v2141_v4  ;;  %2162 = vlog2.f32 %v1331_v11  ;;  %v3269_v3 = vadd.f32 %v1428_v23, %v1390_v42  ;;  %v1333_v22 = vld [vmem:[#allocation3 + $0x60] sm:$0xff] }
 0x63f   :  { %v2145_v61 = vpop.eup %2144  ;;  %v1352_v57 = vmul.f32 0.6931472, %v2143_v46  ;;  %v3263_v15 = vadd.f32 %v1340_v43, %v1306_v50  ;;  %2164 = vlog2.f32 %v1411_v53  ;;  %v3282_v51 = vadd.f32 %v1346_v54, %v1309_v55  ;;  %v1314_v46 = vld [vmem:[#allocation2 + $0x48] sm:$0xff] }
 0x640   :  { %v2147_v36 = vpop.eup %2146  ;;  %v1432_v38 = vmul.f32 0.6931472, %v2145_v61  ;;  %v3267_v63 = vadd.f32 %v1348_v16, %v1310_v10  ;;  %2166 = vlog2.f32 %v1334_v30  ;;  %v3287_v0 = vadd.f32 %v1426_v58, %v1389_v44 }
 0x641   :  { %v2149_v29 = vpop.eup %2148  ;;  %v1350_v62 = vmul.f32 0.6931472, %v2147_v36  ;;  %v3289_v5 = vadd.f32 %v1352_v57, %v1312_v1  ;;  %2168 = vlog2.f32 %v1414_v40  ;;  %v3302_v50 = vadd.s32 88, %v3223_v27  ;;  %v1335_v36 = vld [vmem:[#allocation3 + $0x70] sm:$0xff] }
 0x642   :  { %v2151_v6 = vpop.eup %2150  ;;  %v1430_v18 = vmul.f32 0.6931472, %v2149_v29  ;;  %v3291_v60 = vadd.f32 %v1432_v38, %v1392_v32  ;;  %2170 = vlog2.f32 %v1333_v22  ;;  %v3318_v43 = vadd.s32 104, %v3223_v27  ;;  %v1415_v57 = vld [vmem:[#allocation5 + $0x70] sm:$0xff] }
 0x643   :  { %v2153_v31 = vpop.eup %2152  ;;  %v1356_v4 = vmul.f32 0.6931472, %v2151_v6  ;;  %v3299_v8 = vadd.f32 %v1350_v62, %v1311_v9  ;;  %2172 = vlog2.f32 %v1413_v59  ;;  %v3321_v35 = vadd.s32 96, %v3223_v27 }
 0x644   :  { %v2155_v33 = vpop.eup %2154  ;;  %v3315_v61 = vadd.f32 %v1430_v18, %v1391_v47  ;;  %2174 = vlog2.f32 %v1336_v45  ;;  %v1436_v53 = vmul.f32 0.6931472, %v2153_v31  ;;  %v1313_v47 = vld [vmem:[#allocation2 + $0x40] sm:$0xff] }
 0x645   :  { %v2157_v16 = vpop.eup %2156  ;;  %v3327_v44 = vadd.f32 %v1356_v4, %v1314_v46  ;;  %v1354_v30 = vmul.f32 0.6931472, %v2155_v33  ;;  %2176 = vlog2.f32 %v1416_v39  ;;  %v1393_v45 = vld [vmem:[#allocation4 + $0x40] sm:$0xff] }
 0x646   :  { %v2159_v54 = vpop.eup %2158  ;;  %v1434_v49 = vmul.f32 0.6931472, %v2157_v16  ;;  %2178 = vlog2.f32 %v1335_v36 }
 0x647   :  { %v2161_v29 = vpop.eup %2160  ;;  %2180 = vlog2.f32 %v1415_v57  ;;  %v3383_v37 = vadd.f32 %v1354_v30, %v1313_v47  ;;  %v1315_v57 = vld [vmem:[#allocation2 + $0x50] sm:$0xff]  ;;  %v1398_v47 = vld [vmem:[#allocation4 + $0x68] sm:$0xff] }
 0x648   :  { %v2163_v38 = vpop.eup %2162  ;;  %v1440_v4 = vmul.f32 0.6931472, %v2161_v29  ;;  %v3385_v17 = vadd.f32 %v1434_v49, %v1393_v45 }
 0x649   :  { %v2165_v62 = vpop.eup %2164 }
 0x64a   :  { %v2167_v31 = vpop.eup %2166 }
 0x64b   :  { %v1364_v25 = vmul.f32 0.6931472, %v2167_v31 }
 0x6ae   :  { %v1502_v20 = vpop.xlane.xlu1 %1501 }
 0x6af   :  { %v1498_v11 = vpop.xlane.xlu0 %1497  ;;  %v1581_v10 = vsub.f32 %v3231_v41, %v1502_v20  ;;  %v1630_v42 = vsub.f32 %v3233_v2, %v1502_v20  ;;  %v1316_v20 = vld [vmem:[#allocation2 + $0x58] sm:$0xff] }
 0x6b0   :  { %v1579_v23 = vsub.f32 %v3235_v26, %v1498_v11  ;;  %v1628_v55 = vsub.f32 %v3243_v7, %v1498_v11  ;;  %v1394_v7 = vld [vmem:[#allocation4 + $0x48] sm:$0xff]  ;;  %v1396_v11 = vld [vmem:[#allocation4 + $0x58] sm:$0xff] }
 0x6b1   :  { %v1597_v58 = vsel %vm1565_vm2, %v1581_v10, 0.0  ;;  %v1646_v41 = vsel %vm1614_vm3, %v1630_v42, 0.0  ;;  %vm1618_vm2 = vcmp.lt.s32.totalorder %v3285_v14, %v3226_v48  ;;  %vm1572_vm3 = vcmp.lt.s32.totalorder %v3294_v52, %v3644_v56 }
 0x6b2   :  { %v1595_v2 = vsel %vm1563_vm4, %v1579_v23, 0.0  ;;  %v1644_v26 = vsel %vm1612_vm5, %v1628_v55, 0.0  ;;  %v1662_v1 = vadd.f32 %v1646_v41, %v1597_v58  ;;  %v1504_v40 = vpop.xlane.xlu1 %1503  ;;  %vm1621_vm4 = vcmp.lt.s32.totalorder %v3294_v52, %v3226_v48 }
 0x6b3   :  { %v1660_v32 = vadd.f32 %v1644_v26, %v1595_v2  ;;  %v1500_v6 = vpop.xlane.xlu0 %1499  ;;  %v1582_v22 = vsub.f32 %v3245_v19, %v1504_v40  ;;  %v1631_v9 = vsub.f32 %v3247_v21, %v1504_v40  ;;  %v3361_v19 = vadd.f32 %v1436_v53, %v1394_v7 }
 0x6b4   :  { %v1580_v18 = vsub.f32 %v3263_v15, %v1500_v6  ;;  %v1629_v59 = vsub.f32 %v3265_v13, %v1500_v6  ;;  %1678 = vst.msk [vmem:[%s3553_s6 + $0x10] sm:$0xff] %vm99_vm0, %v1662_v1  ;;  %v1360_v21 = vmul.f32 0.6931472, %v2159_v54  ;;  %v2169_v15 = vpop.eup %2168  ;;  %vm1571_vm5 = vcmp.lt.s32.totalorder %v3297_v34, %v3644_v56  ;;  %v1395_v1 = vld [vmem:[#allocation4 + $0x50] sm:$0xff] }
 0x6b5   :  { %1676 = vst.msk [vmem:[%s3553_s6] sm:$0xff] %vm99_vm0, %v1660_v32  ;;  %v1598_v13 = vsel %vm1566_vm6, %v1582_v22, 0.0  ;;  %v1647_v33 = vsel %vm1615_vm7, %v1631_v9, 0.0  ;;  %v2171_v16 = vpop.eup %2170  ;;  %vm1620_vm6 = vcmp.lt.s32.totalorder %v3297_v34, %v3226_v48  ;;  %v1438_v2 = vmul.f32 0.6931472, %v2165_v62 }
 0x6b6   :  { %v1596_v46 = vsel %vm1564_vm8, %v1580_v18, 0.0  ;;  %v1645_v39 = vsel %vm1613_vm9, %v1629_v59, 0.0  ;;  %v1663_v10 = vadd.f32 %v1647_v33, %v1598_v13  ;;  %v1508_v23 = vpop.xlane.xlu1 %1507  ;;  %v2173_v36 = vpop.eup %2172  ;;  %v3399_v30 = vadd.f32 %v1360_v21, %v1316_v20  ;;  %v1318_v59 = vld [vmem:[#allocation2 + $0x68] sm:$0xff]  ;;  %v1317_v13 = vld [vmem:[#allocation2 + $0x60] sm:$0xff] }
 0x6b7   :  { %v1661_v42 = vadd.f32 %v1645_v39, %v1596_v46  ;;  %v1506_v55 = vpop.xlane.xlu0 %1505  ;;  %v1584_v54 = vsub.f32 %v3267_v63, %v1508_v23  ;;  %v1633_v53 = vsub.f32 %v3269_v3, %v1508_v23  ;;  %v2175_v41 = vpop.eup %2174  ;;  %v3401_v63 = vadd.f32 %v1440_v4, %v1396_v11  ;;  %v1397_v33 = vld [vmem:[#allocation4 + $0x60] sm:$0xff] }
 0x6b8   :  { %v1583_v29 = vsub.f32 %v3282_v51, %v1506_v55  ;;  %v1632_v58 = vsub.f32 %v3287_v0, %v1506_v55  ;;  %1679 = vst.msk [vmem:[%s3553_s6 + $0x18] sm:$0xff] %vm99_vm0, %v1663_v10  ;;  %v1358_v3 = vmul.f32 0.6931472, %v2163_v38  ;;  %v2177_v38 = vpop.eup %2176  ;;  %vm1574_vm7 = vcmp.lt.s32.totalorder %v3302_v50, %v3644_v56 }
 0x6b9   :  { %1677 = vst.msk [vmem:[%s3553_s6 + $0x8] sm:$0xff] %vm99_vm0, %v1661_v42  ;;  %v1600_v51 = vsel %vm1568_vm10, %v1584_v54, 0.0  ;;  %v1649_v0 = vsel %vm1617_vm11, %v1633_v53, 0.0  ;;  %vm1623_vm8 = vcmp.lt.s32.totalorder %v3302_v50, %v3226_v48  ;;  %vm1573_vm9 = vcmp.lt.s32.totalorder %v3305_v24, %v3644_v56  ;;  %v2179_v45 = vpop.eup %2178 }
 0x6ba   :  { %v1599_v26 = vsel %vm1567_vm12, %v1583_v29, 0.0  ;;  %v1648_v7 = vsel %vm1616_vm13, %v1632_v58, 0.0  ;;  %v1665_v32 = vadd.f32 %v1649_v0, %v1600_v51  ;;  %v1512_v6 = vpop.xlane.xlu1 %1511  ;;  %vm1622_vm10 = vcmp.lt.s32.totalorder %v3305_v24, %v3226_v48  ;;  %v2181_v46 = vpop.eup %2180  ;;  %v1320_v58 = vld [vmem:[#allocation2 + $0x78] sm:$0xff] }
 0x6bb   :  { %v1664_v40 = vadd.f32 %v1648_v7, %v1599_v26  ;;  %v1510_v49 = vpop.xlane.xlu0 %1509  ;;  %v1444_v28 = vmul.f32 0.6931472, %v2169_v15  ;;  %v1586_v62 = vsub.f32 %v3289_v5, %v1512_v6  ;;  %v1635_v22 = vsub.f32 %v3291_v60, %v1512_v6 }
 0x6bc   :  { %v1585_v9 = vsub.f32 %v3299_v8, %v1510_v49  ;;  %v1634_v18 = vsub.f32 %v3315_v61, %v1510_v49  ;;  %1681 = vst.msk [vmem:[%s3553_s6 + $0x28] sm:$0xff] %vm99_vm0, %v1665_v32  ;;  %v1379_v5 = vadd.f32 %v1358_v3, %v1315_v57  ;;  %v1459_v31 = vadd.f32 %v1438_v2, %v1395_v1  ;;  %v1400_v3 = vld [vmem:[#allocation4 + $0x78] sm:$0xff]  ;;  %v1319_v32 = vld [vmem:[#allocation2 + $0x70] sm:$0xff] }
 0x6bd   :  { %1680 = vst.msk [vmem:[%s3553_s6 + $0x20] sm:$0xff] %vm99_vm0, %v1664_v40  ;;  %v1362_v60 = vmul.f32 0.6931472, %v2171_v16  ;;  %v1442_v21 = vmul.f32 0.6931472, %v2173_v36  ;;  %v1602_v8 = vsel %vm1570_vm14, %v1586_v62, 0.0  ;;  %vm1576_vm11 = vcmp.lt.s32.totalorder %v3318_v43, %v3644_v56 }
 0x6be   :  { %v1651_v61 = vsel %vm1619_vm15, %v1635_v22, 0.0  ;;  %v1601_v4 = vsel %vm1569_vm1, %v1585_v9, 0.0  ;;  %v1650_v15 = vsel %vm1618_vm2, %v1634_v18, 0.0  ;;  %v1516_v11 = vpop.xlane.xlu1 %1515  ;;  %vm1625_vm12 = vcmp.lt.s32.totalorder %v3318_v43, %v3226_v48  ;;  %v1399_v40 = vld [vmem:[#allocation4 + $0x70] sm:$0xff] }
 0x6bf   :  { %v1667_v39 = vadd.f32 %v1651_v61, %v1602_v8  ;;  %v1666_v20 = vadd.f32 %v1650_v15, %v1601_v4  ;;  %v1514_v16 = vpop.xlane.xlu0 %1513  ;;  %v1382_v12 = vadd.f32 %v1364_v25, %v1318_v59  ;;  %v1462_v10 = vadd.f32 %v1444_v28, %v1398_v47 }
 0x6c0   :  { %vm1575_vm13 = vcmp.lt.s32.totalorder %v3321_v35, %v3644_v56  ;;  %vm1624_vm14 = vcmp.lt.s32.totalorder %v3321_v35, %v3226_v48  ;;  %v1588_v14 = vsub.f32 %v3327_v44, %v1516_v11  ;;  %v1637_v42 = vsub.f32 %v3361_v19, %v1516_v11 }
 0x6c1   :  { %v1587_v23 = vsub.f32 %v3383_v37, %v1514_v16  ;;  %v1636_v55 = vsub.f32 %v3385_v17, %v1514_v16  ;;  %1683 = vst.msk [vmem:[%s3553_s6 + $0x38] sm:$0xff] %vm99_vm0, %v1667_v39  ;;  %1682 = vst.msk [vmem:[%s3553_s6 + $0x30] sm:$0xff] %vm99_vm0, %v1666_v20  ;;  %v1381_v36 = vadd.f32 %v1362_v60, %v1317_v13  ;;  %v1368_v53 = vmul.f32 0.6931472, %v2175_v41 }
 0x6c2   :  { %v1461_v54 = vadd.f32 %v1442_v21, %v1397_v33  ;;  %v1448_v44 = vmul.f32 0.6931472, %v2177_v38  ;;  %v1604_v19 = vsel %vm1572_vm3, %v1588_v14, 0.0  ;;  %v1653_v37 = vsel %vm1621_vm4, %v1637_v42, 0.0  ;;  %v1520_v51 = vpop.xlane.xlu1 %1519 }
 0x6c3   :  { %v1603_v17 = vsel %vm1571_vm5, %v1587_v23, 0.0  ;;  %v1652_v29 = vsel %vm1620_vm6, %v1636_v55, 0.0  ;;  %v1669_v41 = vadd.f32 %v1653_v37, %v1604_v19  ;;  %v1518_v0 = vpop.xlane.xlu0 %1517  ;;  %v1366_v26 = vmul.f32 0.6931472, %v2179_v45 }
 0x6c4   :  { %v1668_v2 = vadd.f32 %v1652_v29, %v1603_v17  ;;  %v1446_v7 = vmul.f32 0.6931472, %v2181_v46  ;;  %v1590_v57 = vsub.f32 %v3399_v30, %v1520_v51  ;;  %v1639_v52 = vsub.f32 %v3401_v63, %v1520_v51 }
 0x6c5   :  { %v1589_v1 = vsub.f32 %v1379_v5, %v1518_v0  ;;  %v1638_v38 = vsub.f32 %v1459_v31, %v1518_v0  ;;  %1685 = vst.msk [vmem:[%s3553_s6 + $0x48] sm:$0xff] %vm99_vm0, %v1669_v41  ;;  %v1545_v34 = vadd.s32 120, %v3223_v27  ;;  %v1384_v6 = vadd.f32 %v1368_v53, %v1320_v58 }
 0x6c6   :  { %1684 = vst.msk [vmem:[%s3553_s6 + $0x40] sm:$0xff] %vm99_vm0, %v1668_v2  ;;  %v1464_v30 = vadd.f32 %v1448_v44, %v1400_v3  ;;  %v1544_v63 = vadd.s32 112, %v3223_v27  ;;  %v1606_v49 = vsel %vm1574_vm7, %v1590_v57, 0.0  ;;  %v1655_v25 = vsel %vm1623_vm8, %v1639_v52, 0.0  ;;  %v1524_v18 = vpop.xlane.xlu1 %1523 }
 0x6c7   :  { %v1605_v28 = vsel %vm1573_vm9, %v1589_v1, 0.0  ;;  %v1654_v62 = vsel %vm1622_vm10, %v1638_v38, 0.0  ;;  %v1671_v22 = vadd.f32 %v1655_v25, %v1606_v49  ;;  %v1522_v27 = vpop.xlane.xlu0 %1521  ;;  %v1383_v59 = vadd.f32 %v1366_v26, %v1319_v32 }
 0x6c8   :  { %v1670_v9 = vadd.f32 %v1654_v62, %v1605_v28  ;;  %v1463_v47 = vadd.f32 %v1446_v7, %v1399_v40  ;;  %v1592_v45 = vsub.f32 %v1382_v12, %v1524_v18  ;;  %v1641_v5 = vsub.f32 %v1462_v10, %v1524_v18 }
 0x6c9   :  { %v1591_v31 = vsub.f32 %v1381_v36, %v1522_v27  ;;  %v1640_v60 = vsub.f32 %v1461_v54, %v1522_v27  ;;  %1687 = vst.msk [vmem:[%s3553_s6 + $0x58] sm:$0xff] %vm99_vm0, %v1671_v22  ;;  %vm1578_vm15 = vcmp.lt.s32.totalorder %v1545_v34, %v3644_v56  ;;  %vm1627_vm1 = vcmp.lt.s32.totalorder %v1545_v34, %v3226_v48 }
 0x6ca   :  { %1686 = vst.msk [vmem:[%s3553_s6 + $0x50] sm:$0xff] %vm99_vm0, %v1670_v9  ;;  %v1608_v50 = vsel %vm1576_vm11, %v1592_v45, 0.0  ;;  %v1657_v24 = vsel %vm1625_vm12, %v1641_v5, 0.0  ;;  %v1528_v15 = vpop.xlane.xlu1 %1527  ;;  %vm1577_vm2 = vcmp.lt.s32.totalorder %v1544_v63, %v3644_v56  ;;  %vm1626_vm3 = vcmp.lt.s32.totalorder %v1544_v63, %v3226_v48 }
 0x6cb   :  { %v1607_v21 = vsel %vm1575_vm13, %v1591_v31, 0.0  ;;  %v1656_v8 = vsel %vm1624_vm14, %v1640_v60, 0.0  ;;  %v1673_v61 = vadd.f32 %v1657_v24, %v1608_v50  ;;  %v1526_v13 = vpop.xlane.xlu0 %1525  ;;  %v1594_v33 = vsub.f32 %v1384_v6, %v1528_v15 }
 0x6cc   :  { %v1672_v4 = vadd.f32 %v1656_v8, %v1607_v21  ;;  %v1643_v46 = vsub.f32 %v1464_v30, %v1528_v15  ;;  %v1593_v43 = vsub.f32 %v1383_v59, %v1526_v13  ;;  %v1642_v39 = vsub.f32 %v1463_v47, %v1526_v13 }
 0x6cd   :  { %1689 = vst.msk [vmem:[%s3553_s6 + $0x68] sm:$0xff] %vm99_vm0, %v1673_v61  ;;  %v1610_v35 = vsel %vm1578_vm15, %v1594_v33, 0.0 }
 0x6ce   :  { %1688 = vst.msk [vmem:[%s3553_s6 + $0x60] sm:$0xff] %vm99_vm0, %v1672_v4  ;;  %v1659_v20 = vsel %vm1627_vm1, %v1643_v46, 0.0  ;;  %v1609_v11 = vsel %vm1577_vm2, %v1593_v43, 0.0  ;;  %v1658_v16 = vsel %vm1626_vm3, %v1642_v39, 0.0 }
 0x6cf   :  { %v1675_v12 = vadd.f32 %v1659_v20, %v1610_v35  ;;  %v1674_v10 = vadd.f32 %v1658_v16, %v1609_v11 }
 0x6d1   :  { %1691 = vst.msk [vmem:[%s3553_s6 + $0x78] sm:$0xff] %vm99_vm0, %v1675_v12  ;;  %1690 = vst.msk [vmem:[%s3553_s6 + $0x70] sm:$0xff] %vm99_vm0, %v1674_v10 }
 0x6d2   :  { %1696 = vsyncpa [#allocation8], 1 }
 0x6d3   :  { %1697 = vsyncpa [#allocation12], 1 }
 0x6d4   :  { %1698 = vsyncpa [#allocation15], 1 }
 0x6d5   :  { %1699 = vsyncpa [#allocation9], 1 }

</bundles_post_ra>
